<compile_context>
chip_gen: v7x
topology: tpu7x:2x2x1
jax: 0.10.0
libtpu: 0.0.40
codegen_flags: <defaults>
</compile_context>

<pallas_src>
import functools

import jax
import jax.numpy as jnp
from jax.experimental import pallas as pl
from jax.experimental.pallas import tpu as pltpu

LANE = 128


def _rup(n, m=LANE):
    return ((n + m - 1) // m) * m


# ----------------------------------------------------------------------------
# Fused forward kernel (single invocation, everything resident in VMEM)
# ----------------------------------------------------------------------------
def _make_fused_kernel(*, rows_in, down_t, stride_t, depth, pad, k_pad,
                       nb_code, code_dim):
    def kernel(x_ref, sqw_ref, sqb_ref, dw_ref, db_ref, uw_ref, ub_ref,
               cb_ref, cbtm2_ref, cc_ref, out_ref, stats_ref):
        def sq_linear(h, idx, relu):
            # bf16 operands, f32 accumulation on the MXU.
            y = jnp.dot(h.astype(jnp.bfloat16), sqw_ref[idx],
                        preferred_element_type=jnp.float32)
            y = y + sqb_ref[idx]
            return jnp.maximum(y, 0.0) if relu else y

        li = 0  # static index into the stacked bf16 weight slab

        # --------------------------- encoder --------------------------------
        h = sq_linear(x_ref[...], li, relu=True); li += 1      # (rows_in, pad)
        rows = rows_in
        for lvl in range(down_t):
            part = rows // stride_t
            # temporal fold: rows are pre-ordered so each stride offset is a
            # contiguous block -> fold == static-slice + lane concat.
            h = jnp.concatenate(
                [h[r * part:(r + 1) * part, :] for r in range(stride_t)],
                axis=1)                                        # (part, s*pad)
            h = jnp.dot(h.astype(jnp.bfloat16), dw_ref[lvl],
                        preferred_element_type=jnp.float32)
            h = jnp.maximum(h + db_ref[lvl], 0.0)
            rows = part
            for _ in range(depth):
                r1 = sq_linear(h, li, relu=True); li += 1
                h = h + sq_linear(r1, li, relu=False); li += 1
        x_enc = sq_linear(h, li, relu=False); li += 1          # (rows_enc, pad)
        rows_enc = rows

        # -------------------- quantizer (EMA-reset, inference) --------------
        # dist = |x|^2 - 2 x.c + |c|^2 ; |c|^2 precomputed at init (padded
        # codes carry 1e30 there so they can never win the argmin), and the
        # transposed codebook is pre-scaled by -2.
        xx = jnp.sum(x_enc * x_enc, axis=-1, keepdims=True)    # (M, 1) f32
        xc2 = jnp.dot(x_enc.astype(jnp.bfloat16), cbtm2_ref[...],
                      preferred_element_type=jnp.float32)      # (M, k_pad)
        dist = xx + xc2 + cc_ref[...]                          # f32
        lane = jax.lax.broadcasted_iota(jnp.int32, dist.shape, 1)
        # argmin via exact equality on the SAME f32 dist array (ties pick the
        # lowest index, matching torch.argmin).  Do not recompute dist in a
        # different precision here.
        min_d = jnp.min(dist, axis=-1, keepdims=True)
        idx = jnp.min(jnp.where(dist == min_d, lane, k_pad),
                      axis=-1, keepdims=True)                  # (M, 1)
        onehot = (lane == idx).astype(jnp.float32)             # (M, k_pad)
        xd = jnp.dot(onehot.astype(jnp.bfloat16), cb_ref[...],
                     preferred_element_type=jnp.float32)       # (M, pad)
        counts = jnp.sum(onehot, axis=0, keepdims=True)        # (1, k_pad)

        # Reference QuantizeEMAReset returns the raw (un-weighted) MSE; padded
        # lanes of x_enc / xd are exactly zero so dividing by code_dim (not
        # pad) gives the true mean.
        sq = (x_enc - xd) ** 2
        loss = (jnp.sum(sq, axis=0, keepdims=True).sum(axis=1, keepdims=True)
                / float(rows_enc * code_dim))                  # (1, 1)
        prob = counts / float(rows_enc)
        perpl = jnp.exp(-jnp.sum(prob * jnp.log(prob + 1e-7),
                                 axis=-1, keepdims=True))      # (1, 1)
        row_s = jax.lax.broadcasted_iota(jnp.int32, (8, LANE), 0)
        lane_s = jax.lax.broadcasted_iota(jnp.int32, (8, LANE), 1)
        stats_ref[...] = (
            jnp.where((row_s == 0) & (lane_s == 0), loss, 0.0)
            + jnp.where((row_s == 0) & (lane_s == 1), perpl, 0.0))

        # --------------------------- decoder --------------------------------
        # straight-through: forward value of the quantized latent is xd.
        h = sq_linear(xd, li, relu=True); li += 1
        rows = rows_enc
        for lvl in range(down_t):
            for _ in range(depth):
                r1 = sq_linear(h, li, relu=True); li += 1
                h = h + sq_linear(r1, li, relu=False); li += 1
            hu = jnp.dot(h.astype(jnp.bfloat16), uw_ref[lvl],
                         preferred_element_type=jnp.float32)
            hu = jnp.maximum(hu + ub_ref[lvl], 0.0)            # (rows, s*pad)
            if lvl == down_t - 1:
                # Last level: apply the output projection per unfold block and
                # store each block directly (no extra full-size VMEM copy; the
                # output writeback DMA overlaps the remaining blocks).
                for r in range(stride_t):
                    blk = sq_linear(hu[:, r * pad:(r + 1) * pad], li,
                                    relu=False)                # (rows, pad)
                    out_ref[r * rows:(r + 1) * rows, :] = blk
                li += 1
            else:
                # temporal unfold: lane slices stacked along rows (row order
                # is undone on the host with a cheap transpose).
                h = jnp.concatenate(
                    [hu[:, r * pad:(r + 1) * pad] for r in range(stride_t)],
                    axis=0)
                rows = rows * stride_t

    return kernel


def _full_block(a):
    nd = a.ndim
    return pl.BlockSpec(a.shape, lambda: (0,) * nd)


# ----------------------------------------------------------------------------
# Parameter construction (padded to 128 lanes, packed, weights stored in bf16)
# ----------------------------------------------------------------------------
def init_params(key, nfeats, width, output_emb_width, down_t, stride_t, depth,
                nb_code, code_dim, pad, k_pad):
    keys = iter(jax.random.split(key, 256))

    def lin_padded(fi, fo):
        w = jax.random.normal(next(keys), (fi, fo), jnp.float32) / jnp.sqrt(
            jnp.float32(fi))
        wp = jnp.zeros((pad, pad), jnp.float32).at[:fi, :fo].set(w)
        bp = jnp.zeros((1, pad), jnp.float32)
        return wp, bp

    def down_padded():
        w = jax.random.normal(next(keys), (stride_t * width, width),
                              jnp.float32) / jnp.sqrt(jnp.float32(stride_t * width))
        wp = jnp.zeros((stride_t * pad, pad), jnp.float32)
        for r in range(stride_t):
            wp = wp.at[r * pad:r * pad + width, :width].set(
                w[r * width:(r + 1) * width, :])
        bp = jnp.zeros((1, pad), jnp.float32)
        return wp, bp

    def up_padded():
        w = jax.random.normal(next(keys), (width, stride_t * width),
                              jnp.float32) / jnp.sqrt(jnp.float32(width))
        wp = jnp.zeros((pad, stride_t * pad), jnp.float32)
        for r in range(stride_t):
            wp = wp.at[:width, r * pad:r * pad + width].set(
                w[:, r * width:(r + 1) * width])
        bp = jnp.zeros((1, stride_t * pad), jnp.float32)
        return wp, bp

    sq_w, sq_b = [], []

    def add_sq(fi, fo):
        w, b = lin_padded(fi, fo)
        sq_w.append(w)
        sq_b.append(b)

    down_w, down_b, up_w, up_b = [], [], [], []

    # encoder (order must match kernel consumption order)
    add_sq(nfeats, width)                          # enc in
    for _ in range(down_t):
        w, b = down_padded(); down_w.append(w); down_b.append(b)
        for _ in range(depth):
            add_sq(width, width); add_sq(width, width)
    add_sq(width, output_emb_width)                # enc out
    # decoder
    add_sq(output_emb_width, width)                # dec in
    for _ in range(down_t):
        for _ in range(depth):
            add_sq(width, width); add_sq(width, width)
        w, b = up_padded(); up_w.append(w); up_b.append(b)
    add_sq(width, nfeats)                          # dec out

    cb = jax.random.normal(next(keys), (nb_code, code_dim), jnp.float32)
    cb_pad = jnp.zeros((k_pad, pad), jnp.float32).at[:nb_code, :code_dim].set(cb)
    # Precomputed codebook squared norms; padded codes get 1e30 so they can
    # never be selected (no in-kernel mask needed).
    cc = jnp.sum(cb_pad * cb_pad, axis=1)[None, :]
    cc = jnp.where(jnp.arange(k_pad)[None, :] < nb_code, cc, 1e30)
    cbt_m2 = (-2.0 * cb_pad.T)                     # pre-transposed & pre-scaled

    bf = jnp.bfloat16
    return {
        "sq_w": jnp.stack(sq_w).astype(bf),        # (n_sq, pad, pad) bf16
        "sq_b": jnp.stack(sq_b),                   # (n_sq, 1, pad) f32
        "down_w": jnp.stack(down_w).astype(bf),    # (down_t, s*pad, pad) bf16
        "down_b": jnp.stack(down_b),               # (down_t, 1, pad) f32
        "up_w": jnp.stack(up_w).astype(bf),        # (down_t, pad, s*pad) bf16
        "up_b": jnp.stack(up_b),                   # (down_t, 1, s*pad) f32
        "cb": cb_pad.astype(bf),                   # (k_pad, pad) bf16
        "cbt_m2": cbt_m2.astype(bf),               # (pad, k_pad) bf16
        "cc": cc.astype(jnp.float32),              # (1, k_pad) f32
    }


# ----------------------------------------------------------------------------
# Forward (mirrors Spatial_MLP_VQVAE_251.forward: returns x_out, loss, perpl)
# ----------------------------------------------------------------------------
def vqvae_forward(x, params, *, nfeats, width, code_dim, nb_code, down_t,
                  stride_t, depth, pad, k_pad):
    N, T, _ = x.shape
    s, L = stride_t, down_t
    assert L >= 1
    assert T % (s ** L) == 0, "T must be divisible by stride_t**down_t"
    t_enc = T // (s ** L)
    rows_in = N * T
    # Keep every fold level's row count a multiple of 8 sublanes so the static
    # row slices never cross (8,128) vreg tile boundaries (no relayouts).
    assert rows_in % (8 * s ** L) == 0, \
        "pad N*T to a multiple of 8*stride_t**down_t"

    # preprocess() is a layout permute in the original; here we additionally
    # reorder rows so the kernel's temporal folds are contiguous-block concats:
    # (n, c, r_L, ..., r_1, f)  ->  (r_1, r_2, ..., r_L, n, c, f)
    xr = x.reshape((N, t_enc) + (s,) * L + (nfeats,))
    perm_in = tuple(2 + (L - k) for k in range(1, L + 1)) + (0, 1, L + 2)
    xp = xr.transpose(perm_in).reshape(rows_in, nfeats)
    xp = jnp.zeros((rows_in, pad), jnp.float32).at[:, :nfeats].set(xp)

    kernel = _make_fused_kernel(rows_in=rows_in, down_t=L, stride_t=s,
                                depth=depth, pad=pad, k_pad=k_pad,
                                nb_code=nb_code, code_dim=code_dim)

    inputs = (xp, params["sq_w"], params["sq_b"], params["down_w"],
              params["down_b"], params["up_w"], params["up_b"],
              params["cb"], params["cbt_m2"], params["cc"])

    out_pad, stats = pl.pallas_call(
        kernel,
        out_shape=(jax.ShapeDtypeStruct((rows_in, pad), jnp.float32),
                   jax.ShapeDtypeStruct((8, LANE), jnp.float32)),
        in_specs=[_full_block(a) for a in inputs],
        out_specs=(pl.BlockSpec((rows_in, pad), lambda: (0, 0)),
                   pl.BlockSpec((8, LANE), lambda: (0, 0))),
        compiler_params=pltpu.CompilerParams(
            vmem_limit_bytes=32 * 1024 * 1024),
    )(*inputs)

    loss = stats[0, 0]
    perplexity = stats[0, 1]

    # postprocess(): undo the decoder's (u_L, ..., u_1, n, c) row ordering and
    # drop the lane padding.
    o = out_pad[:, :nfeats].reshape((s,) * L + (N, t_enc, nfeats))
    perm_out = (L, L + 1) + tuple(L - k for k in range(1, L + 1)) + (L + 2,)
    x_out = o.transpose(perm_out).reshape(N, T, nfeats)
    return x_out, loss, perplexity


# ----------------------------------------------------------------------------
# Main
# ----------------------------------------------------------------------------
if __name__ == "__main__":
    # Small shapes consistent with the module (nfeats, T, width, nb_code, ...).
    N, T, nfeats = 2, 16, 8
    width = 32
    output_emb_width = code_dim = 32
    nb_code = 64
    down_t, stride_t, depth = 2, 2, 2

    pad = _rup(max(nfeats, width, output_emb_width, code_dim))   # 128 lanes
    k_pad = _rup(nb_code)                                        # 128 codes

    key = jax.random.PRNGKey(0)
    k_params, k_x = jax.random.split(key)
    params = init_params(k_params, nfeats, width, output_emb_width, down_t,
                         stride_t, depth, nb_code, code_dim, pad, k_pad)
    x = jax.random.normal(k_x, (N, T, nfeats), jnp.float32)

    fwd = jax.jit(functools.partial(
        vqvae_forward, nfeats=nfeats, width=width, code_dim=code_dim,
        nb_code=nb_code, down_t=down_t, stride_t=stride_t, depth=depth,
        pad=pad, k_pad=k_pad))
    x_out, loss, perplexity = fwd(x, params)
    jax.block_until_ready((x_out, loss, perplexity))

    assert x_out.shape == (N, T, nfeats) and x_out.dtype == jnp.float32
    assert loss.shape == () and perplexity.shape == ()
    assert bool(jnp.all(jnp.isfinite(x_out)))
    assert bool(jnp.isfinite(loss)) and bool(jnp.isfinite(perplexity))
    print("KERNEL_OK")
</pallas_src>

<mosaic_0001>
module attributes {stable_mosaic.version = 11 : i64} {
  func.func @kernel(%arg0: memref<32x128xf32, #tpu.memory_space<vmem>>, %arg1: memref<20x128x128xbf16, #tpu.memory_space<vmem>>, %arg2: memref<20x1x128xf32, #tpu.memory_space<vmem>>, %arg3: memref<2x256x128xbf16, #tpu.memory_space<vmem>>, %arg4: memref<2x1x128xf32, #tpu.memory_space<vmem>>, %arg5: memref<2x128x256xbf16, #tpu.memory_space<vmem>>, %arg6: memref<2x1x256xf32, #tpu.memory_space<vmem>>, %arg7: memref<128x128xbf16, #tpu.memory_space<vmem>>, %arg8: memref<128x128xbf16, #tpu.memory_space<vmem>>, %arg9: memref<1x128xf32, #tpu.memory_space<vmem>>, %arg10: memref<32x128xf32, #tpu.memory_space<vmem>>, %arg11: memref<8x128xf32, #tpu.memory_space<vmem>>) attributes {dimension_semantics = [], scalar_prefetch = 0 : i64, scratch_operands = 0 : i64, tpu.core_type = #tpu.core_type<tc>} {
    %c0 = arith.constant 0 : index
    %c0_0 = arith.constant 0 : index
    %0 = vector.load %arg0[%c0, %c0_0] : memref<32x128xf32, #tpu.memory_space<vmem>>, vector<32x128xf32>
    %1 = arith.truncf %0 : vector<32x128xf32> to vector<32x128xbf16>
    %c0_1 = arith.constant 0 : index
    %c0_2 = arith.constant 0 : index
    %c0_3 = arith.constant 0 : index
    %2 = vector.load %arg1[%c0_1, %c0_2, %c0_3] : memref<20x128x128xbf16, #tpu.memory_space<vmem>>, vector<1x128x128xbf16>
    %3 = vector.shape_cast %2 : vector<1x128x128xbf16> to vector<128x128xbf16>
    %cst = arith.constant dense<0.000000e+00> : vector<32x128xf32>
    %4 = tpu.matmul %1, %3, %cst {dimension_numbers = #tpu.dot_dimension_numbers<[1], [0], [0], [1], [0, 0, 1, 1], [], []>} : vector<32x128xbf16>, vector<128x128xbf16>, vector<32x128xf32> -> vector<32x128xf32>
    %c0_4 = arith.constant 0 : index
    %c0_5 = arith.constant 0 : index
    %c0_6 = arith.constant 0 : index
    %5 = vector.load %arg2[%c0_4, %c0_5, %c0_6] : memref<20x1x128xf32, #tpu.memory_space<vmem>>, vector<1x1x128xf32>
    %6 = vector.shape_cast %5 : vector<1x1x128xf32> to vector<1x128xf32>
    %7 = vector.broadcast %6 : vector<1x128xf32> to vector<32x128xf32>
    %8 = arith.addf %4, %7 : vector<32x128xf32>
    %cst_7 = arith.constant 0.000000e+00 : f32
    %9 = vector.broadcast %cst_7 : f32 to vector<32x128xf32>
    %10 = arith.maximumf %8, %9 : vector<32x128xf32>
    %11 = vector.extract_strided_slice %10 {offsets = [0, 0], sizes = [16, 128], strides = [1, 1]} : vector<32x128xf32> to vector<16x128xf32>
    %12 = vector.extract_strided_slice %10 {offsets = [16, 0], sizes = [16, 128], strides = [1, 1]} : vector<32x128xf32> to vector<16x128xf32>
    %13 = tpu.concatenate %11, %12 in 1 : vector<16x128xf32>, vector<16x128xf32> -> vector<16x256xf32>
    %14 = arith.truncf %13 : vector<16x256xf32> to vector<16x256xbf16>
    %c0_8 = arith.constant 0 : index
    %c0_9 = arith.constant 0 : index
    %c0_10 = arith.constant 0 : index
    %15 = vector.load %arg3[%c0_8, %c0_9, %c0_10] : memref<2x256x128xbf16, #tpu.memory_space<vmem>>, vector<1x256x128xbf16>
    %16 = vector.shape_cast %15 : vector<1x256x128xbf16> to vector<256x128xbf16>
    %cst_11 = arith.constant dense<0.000000e+00> : vector<16x128xf32>
    %17 = tpu.matmul %14, %16, %cst_11 {dimension_numbers = #tpu.dot_dimension_numbers<[1], [0], [0], [1], [0, 0, 1, 1], [], []>} : vector<16x256xbf16>, vector<256x128xbf16>, vector<16x128xf32> -> vector<16x128xf32>
    %c0_12 = arith.constant 0 : index
    %c0_13 = arith.constant 0 : index
    %c0_14 = arith.constant 0 : index
    %18 = vector.load %arg4[%c0_12, %c0_13, %c0_14] : memref<2x1x128xf32, #tpu.memory_space<vmem>>, vector<1x1x128xf32>
    %19 = vector.shape_cast %18 : vector<1x1x128xf32> to vector<1x128xf32>
    %20 = vector.broadcast %19 : vector<1x128xf32> to vector<16x128xf32>
    %21 = arith.addf %17, %20 : vector<16x128xf32>
    %cst_15 = arith.constant 0.000000e+00 : f32
    %22 = vector.broadcast %cst_15 : f32 to vector<16x128xf32>
    %23 = arith.maximumf %21, %22 : vector<16x128xf32>
    %24 = arith.truncf %23 : vector<16x128xf32> to vector<16x128xbf16>
    %c1 = arith.constant 1 : index
    %c0_16 = arith.constant 0 : index
    %c0_17 = arith.constant 0 : index
    %25 = vector.load %arg1[%c1, %c0_16, %c0_17] : memref<20x128x128xbf16, #tpu.memory_space<vmem>>, vector<1x128x128xbf16>
    %26 = vector.shape_cast %25 : vector<1x128x128xbf16> to vector<128x128xbf16>
    %cst_18 = arith.constant dense<0.000000e+00> : vector<16x128xf32>
    %27 = tpu.matmul %24, %26, %cst_18 {dimension_numbers = #tpu.dot_dimension_numbers<[1], [0], [0], [1], [0, 0, 1, 1], [], []>} : vector<16x128xbf16>, vector<128x128xbf16>, vector<16x128xf32> -> vector<16x128xf32>
    %c1_19 = arith.constant 1 : index
    %c0_20 = arith.constant 0 : index
    %c0_21 = arith.constant 0 : index
    %28 = vector.load %arg2[%c1_19, %c0_20, %c0_21] : memref<20x1x128xf32, #tpu.memory_space<vmem>>, vector<1x1x128xf32>
    %29 = vector.shape_cast %28 : vector<1x1x128xf32> to vector<1x128xf32>
    %30 = vector.broadcast %29 : vector<1x128xf32> to vector<16x128xf32>
    %31 = arith.addf %27, %30 : vector<16x128xf32>
    %cst_22 = arith.constant 0.000000e+00 : f32
    %32 = vector.broadcast %cst_22 : f32 to vector<16x128xf32>
    %33 = arith.maximumf %31, %32 : vector<16x128xf32>
    %34 = arith.truncf %33 : vector<16x128xf32> to vector<16x128xbf16>
    %c2 = arith.constant 2 : index
    %c0_23 = arith.constant 0 : index
    %c0_24 = arith.constant 0 : index
    %35 = vector.load %arg1[%c2, %c0_23, %c0_24] : memref<20x128x128xbf16, #tpu.memory_space<vmem>>, vector<1x128x128xbf16>
    %36 = vector.shape_cast %35 : vector<1x128x128xbf16> to vector<128x128xbf16>
    %cst_25 = arith.constant dense<0.000000e+00> : vector<16x128xf32>
    %37 = tpu.matmul %34, %36, %cst_25 {dimension_numbers = #tpu.dot_dimension_numbers<[1], [0], [0], [1], [0, 0, 1, 1], [], []>} : vector<16x128xbf16>, vector<128x128xbf16>, vector<16x128xf32> -> vector<16x128xf32>
    %c2_26 = arith.constant 2 : index
    %c0_27 = arith.constant 0 : index
    %c0_28 = arith.constant 0 : index
    %38 = vector.load %arg2[%c2_26, %c0_27, %c0_28] : memref<20x1x128xf32, #tpu.memory_space<vmem>>, vector<1x1x128xf32>
    %39 = vector.shape_cast %38 : vector<1x1x128xf32> to vector<1x128xf32>
    %40 = vector.broadcast %39 : vector<1x128xf32> to vector<16x128xf32>
    %41 = arith.addf %37, %40 : vector<16x128xf32>
    %42 = arith.addf %23, %41 : vector<16x128xf32>
    %43 = arith.truncf %42 : vector<16x128xf32> to vector<16x128xbf16>
    %c3 = arith.constant 3 : index
    %c0_29 = arith.constant 0 : index
    %c0_30 = arith.constant 0 : index
    %44 = vector.load %arg1[%c3, %c0_29, %c0_30] : memref<20x128x128xbf16, #tpu.memory_space<vmem>>, vector<1x128x128xbf16>
    %45 = vector.shape_cast %44 : vector<1x128x128xbf16> to vector<128x128xbf16>
    %cst_31 = arith.constant dense<0.000000e+00> : vector<16x128xf32>
    %46 = tpu.matmul %43, %45, %cst_31 {dimension_numbers = #tpu.dot_dimension_numbers<[1], [0], [0], [1], [0, 0, 1, 1], [], []>} : vector<16x128xbf16>, vector<128x128xbf16>, vector<16x128xf32> -> vector<16x128xf32>
    %c3_32 = arith.constant 3 : index
    %c0_33 = arith.constant 0 : index
    %c0_34 = arith.constant 0 : index
    %47 = vector.load %arg2[%c3_32, %c0_33, %c0_34] : memref<20x1x128xf32, #tpu.memory_space<vmem>>, vector<1x1x128xf32>
    %48 = vector.shape_cast %47 : vector<1x1x128xf32> to vector<1x128xf32>
    %49 = vector.broadcast %48 : vector<1x128xf32> to vector<16x128xf32>
    %50 = arith.addf %46, %49 : vector<16x128xf32>
    %cst_35 = arith.constant 0.000000e+00 : f32
    %51 = vector.broadcast %cst_35 : f32 to vector<16x128xf32>
    %52 = arith.maximumf %50, %51 : vector<16x128xf32>
    %53 = arith.truncf %52 : vector<16x128xf32> to vector<16x128xbf16>
    %c4 = arith.constant 4 : index
    %c0_36 = arith.constant 0 : index
    %c0_37 = arith.constant 0 : index
    %54 = vector.load %arg1[%c4, %c0_36, %c0_37] : memref<20x128x128xbf16, #tpu.memory_space<vmem>>, vector<1x128x128xbf16>
    %55 = vector.shape_cast %54 : vector<1x128x128xbf16> to vector<128x128xbf16>
    %cst_38 = arith.constant dense<0.000000e+00> : vector<16x128xf32>
    %56 = tpu.matmul %53, %55, %cst_38 {dimension_numbers = #tpu.dot_dimension_numbers<[1], [0], [0], [1], [0, 0, 1, 1], [], []>} : vector<16x128xbf16>, vector<128x128xbf16>, vector<16x128xf32> -> vector<16x128xf32>
    %c4_39 = arith.constant 4 : index
    %c0_40 = arith.constant 0 : index
    %c0_41 = arith.constant 0 : index
    %57 = vector.load %arg2[%c4_39, %c0_40, %c0_41] : memref<20x1x128xf32, #tpu.memory_space<vmem>>, vector<1x1x128xf32>
    %58 = vector.shape_cast %57 : vector<1x1x128xf32> to vector<1x128xf32>
    %59 = vector.broadcast %58 : vector<1x128xf32> to vector<16x128xf32>
    %60 = arith.addf %56, %59 : vector<16x128xf32>
    %61 = arith.addf %42, %60 : vector<16x128xf32>
    %62 = vector.extract_strided_slice %61 {offsets = [0, 0], sizes = [8, 128], strides = [1, 1]} : vector<16x128xf32> to vector<8x128xf32>
    %63 = vector.extract_strided_slice %61 {offsets = [8, 0], sizes = [8, 128], strides = [1, 1]} : vector<16x128xf32> to vector<8x128xf32>
    %64 = tpu.concatenate %62, %63 in 1 : vector<8x128xf32>, vector<8x128xf32> -> vector<8x256xf32>
    %65 = arith.truncf %64 : vector<8x256xf32> to vector<8x256xbf16>
    %c1_42 = arith.constant 1 : index
    %c0_43 = arith.constant 0 : index
    %c0_44 = arith.constant 0 : index
    %66 = vector.load %arg3[%c1_42, %c0_43, %c0_44] : memref<2x256x128xbf16, #tpu.memory_space<vmem>>, vector<1x256x128xbf16>
    %67 = vector.shape_cast %66 : vector<1x256x128xbf16> to vector<256x128xbf16>
    %cst_45 = arith.constant dense<0.000000e+00> : vector<8x128xf32>
    %68 = tpu.matmul %65, %67, %cst_45 {dimension_numbers = #tpu.dot_dimension_numbers<[1], [0], [0], [1], [0, 0, 1, 1], [], []>} : vector<8x256xbf16>, vector<256x128xbf16>, vector<8x128xf32> -> vector<8x128xf32>
    %c1_46 = arith.constant 1 : index
    %c0_47 = arith.constant 0 : index
    %c0_48 = arith.constant 0 : index
    %69 = vector.load %arg4[%c1_46, %c0_47, %c0_48] : memref<2x1x128xf32, #tpu.memory_space<vmem>>, vector<1x1x128xf32>
    %70 = vector.shape_cast %69 : vector<1x1x128xf32> to vector<1x128xf32>
    %71 = vector.broadcast %70 : vector<1x128xf32> to vector<8x128xf32>
    %72 = arith.addf %68, %71 : vector<8x128xf32>
    %cst_49 = arith.constant 0.000000e+00 : f32
    %73 = vector.broadcast %cst_49 : f32 to vector<8x128xf32>
    %74 = arith.maximumf %72, %73 : vector<8x128xf32>
    %75 = arith.truncf %74 : vector<8x128xf32> to vector<8x128xbf16>
    %c5 = arith.constant 5 : index
    %c0_50 = arith.constant 0 : index
    %c0_51 = arith.constant 0 : index
    %76 = vector.load %arg1[%c5, %c0_50, %c0_51] : memref<20x128x128xbf16, #tpu.memory_space<vmem>>, vector<1x128x128xbf16>
    %77 = vector.shape_cast %76 : vector<1x128x128xbf16> to vector<128x128xbf16>
    %cst_52 = arith.constant dense<0.000000e+00> : vector<8x128xf32>
    %78 = tpu.matmul %75, %77, %cst_52 {dimension_numbers = #tpu.dot_dimension_numbers<[1], [0], [0], [1], [0, 0, 1, 1], [], []>} : vector<8x128xbf16>, vector<128x128xbf16>, vector<8x128xf32> -> vector<8x128xf32>
    %c5_53 = arith.constant 5 : index
    %c0_54 = arith.constant 0 : index
    %c0_55 = arith.constant 0 : index
    %79 = vector.load %arg2[%c5_53, %c0_54, %c0_55] : memref<20x1x128xf32, #tpu.memory_space<vmem>>, vector<1x1x128xf32>
    %80 = vector.shape_cast %79 : vector<1x1x128xf32> to vector<1x128xf32>
    %81 = vector.broadcast %80 : vector<1x128xf32> to vector<8x128xf32>
    %82 = arith.addf %78, %81 : vector<8x128xf32>
    %cst_56 = arith.constant 0.000000e+00 : f32
    %83 = vector.broadcast %cst_56 : f32 to vector<8x128xf32>
    %84 = arith.maximumf %82, %83 : vector<8x128xf32>
    %85 = arith.truncf %84 : vector<8x128xf32> to vector<8x128xbf16>
    %c6 = arith.constant 6 : index
    %c0_57 = arith.constant 0 : index
    %c0_58 = arith.constant 0 : index
    %86 = vector.load %arg1[%c6, %c0_57, %c0_58] : memref<20x128x128xbf16, #tpu.memory_space<vmem>>, vector<1x128x128xbf16>
    %87 = vector.shape_cast %86 : vector<1x128x128xbf16> to vector<128x128xbf16>
    %cst_59 = arith.constant dense<0.000000e+00> : vector<8x128xf32>
    %88 = tpu.matmul %85, %87, %cst_59 {dimension_numbers = #tpu.dot_dimension_numbers<[1], [0], [0], [1], [0, 0, 1, 1], [], []>} : vector<8x128xbf16>, vector<128x128xbf16>, vector<8x128xf32> -> vector<8x128xf32>
    %c6_60 = arith.constant 6 : index
    %c0_61 = arith.constant 0 : index
    %c0_62 = arith.constant 0 : index
    %89 = vector.load %arg2[%c6_60, %c0_61, %c0_62] : memref<20x1x128xf32, #tpu.memory_space<vmem>>, vector<1x1x128xf32>
    %90 = vector.shape_cast %89 : vector<1x1x128xf32> to vector<1x128xf32>
    %91 = vector.broadcast %90 : vector<1x128xf32> to vector<8x128xf32>
    %92 = arith.addf %88, %91 : vector<8x128xf32>
    %93 = arith.addf %74, %92 : vector<8x128xf32>
    %94 = arith.truncf %93 : vector<8x128xf32> to vector<8x128xbf16>
    %c7 = arith.constant 7 : index
    %c0_63 = arith.constant 0 : index
    %c0_64 = arith.constant 0 : index
    %95 = vector.load %arg1[%c7, %c0_63, %c0_64] : memref<20x128x128xbf16, #tpu.memory_space<vmem>>, vector<1x128x128xbf16>
    %96 = vector.shape_cast %95 : vector<1x128x128xbf16> to vector<128x128xbf16>
    %cst_65 = arith.constant dense<0.000000e+00> : vector<8x128xf32>
    %97 = tpu.matmul %94, %96, %cst_65 {dimension_numbers = #tpu.dot_dimension_numbers<[1], [0], [0], [1], [0, 0, 1, 1], [], []>} : vector<8x128xbf16>, vector<128x128xbf16>, vector<8x128xf32> -> vector<8x128xf32>
    %c7_66 = arith.constant 7 : index
    %c0_67 = arith.constant 0 : index
    %c0_68 = arith.constant 0 : index
    %98 = vector.load %arg2[%c7_66, %c0_67, %c0_68] : memref<20x1x128xf32, #tpu.memory_space<vmem>>, vector<1x1x128xf32>
    %99 = vector.shape_cast %98 : vector<1x1x128xf32> to vector<1x128xf32>
    %100 = vector.broadcast %99 : vector<1x128xf32> to vector<8x128xf32>
    %101 = arith.addf %97, %100 : vector<8x128xf32>
    %cst_69 = arith.constant 0.000000e+00 : f32
    %102 = vector.broadcast %cst_69 : f32 to vector<8x128xf32>
    %103 = arith.maximumf %101, %102 : vector<8x128xf32>
    %104 = arith.truncf %103 : vector<8x128xf32> to vector<8x128xbf16>
    %c8 = arith.constant 8 : index
    %c0_70 = arith.constant 0 : index
    %c0_71 = arith.constant 0 : index
    %105 = vector.load %arg1[%c8, %c0_70, %c0_71] : memref<20x128x128xbf16, #tpu.memory_space<vmem>>, vector<1x128x128xbf16>
    %106 = vector.shape_cast %105 : vector<1x128x128xbf16> to vector<128x128xbf16>
    %cst_72 = arith.constant dense<0.000000e+00> : vector<8x128xf32>
    %107 = tpu.matmul %104, %106, %cst_72 {dimension_numbers = #tpu.dot_dimension_numbers<[1], [0], [0], [1], [0, 0, 1, 1], [], []>} : vector<8x128xbf16>, vector<128x128xbf16>, vector<8x128xf32> -> vector<8x128xf32>
    %c8_73 = arith.constant 8 : index
    %c0_74 = arith.constant 0 : index
    %c0_75 = arith.constant 0 : index
    %108 = vector.load %arg2[%c8_73, %c0_74, %c0_75] : memref<20x1x128xf32, #tpu.memory_space<vmem>>, vector<1x1x128xf32>
    %109 = vector.shape_cast %108 : vector<1x1x128xf32> to vector<1x128xf32>
    %110 = vector.broadcast %109 : vector<1x128xf32> to vector<8x128xf32>
    %111 = arith.addf %107, %110 : vector<8x128xf32>
    %112 = arith.addf %93, %111 : vector<8x128xf32>
    %113 = arith.truncf %112 : vector<8x128xf32> to vector<8x128xbf16>
    %c9 = arith.constant 9 : index
    %c0_76 = arith.constant 0 : index
    %c0_77 = arith.constant 0 : index
    %114 = vector.load %arg1[%c9, %c0_76, %c0_77] : memref<20x128x128xbf16, #tpu.memory_space<vmem>>, vector<1x128x128xbf16>
    %115 = vector.shape_cast %114 : vector<1x128x128xbf16> to vector<128x128xbf16>
    %cst_78 = arith.constant dense<0.000000e+00> : vector<8x128xf32>
    %116 = tpu.matmul %113, %115, %cst_78 {dimension_numbers = #tpu.dot_dimension_numbers<[1], [0], [0], [1], [0, 0, 1, 1], [], []>} : vector<8x128xbf16>, vector<128x128xbf16>, vector<8x128xf32> -> vector<8x128xf32>
    %c9_79 = arith.constant 9 : index
    %c0_80 = arith.constant 0 : index
    %c0_81 = arith.constant 0 : index
    %117 = vector.load %arg2[%c9_79, %c0_80, %c0_81] : memref<20x1x128xf32, #tpu.memory_space<vmem>>, vector<1x1x128xf32>
    %118 = vector.shape_cast %117 : vector<1x1x128xf32> to vector<1x128xf32>
    %119 = vector.broadcast %118 : vector<1x128xf32> to vector<8x128xf32>
    %120 = arith.addf %116, %119 : vector<8x128xf32>
    %121 = arith.mulf %120, %120 : vector<8x128xf32>
    %cst_82 = arith.constant dense<0.000000e+00> : vector<8xf32>
    %122 = vector.multi_reduction <add>, %121, %cst_82 [1] : vector<8x128xf32> to vector<8xf32>
    %123 = vector.shape_cast %122 : vector<8xf32> to vector<8x1xf32>
    %124 = arith.truncf %120 : vector<8x128xf32> to vector<8x128xbf16>
    %c0_83 = arith.constant 0 : index
    %c0_84 = arith.constant 0 : index
    %125 = vector.load %arg8[%c0_83, %c0_84] : memref<128x128xbf16, #tpu.memory_space<vmem>>, vector<128x128xbf16>
    %cst_85 = arith.constant dense<0.000000e+00> : vector<8x128xf32>
    %126 = tpu.matmul %124, %125, %cst_85 {dimension_numbers = #tpu.dot_dimension_numbers<[1], [0], [0], [1], [0, 0, 1, 1], [], []>} : vector<8x128xbf16>, vector<128x128xbf16>, vector<8x128xf32> -> vector<8x128xf32>
    %127 = vector.broadcast %123 : vector<8x1xf32> to vector<8x128xf32>
    %128 = arith.addf %127, %126 : vector<8x128xf32>
    %c0_86 = arith.constant 0 : index
    %c0_87 = arith.constant 0 : index
    %129 = vector.load %arg9[%c0_86, %c0_87] : memref<1x128xf32, #tpu.memory_space<vmem>>, vector<1x128xf32>
    %130 = vector.broadcast %129 : vector<1x128xf32> to vector<8x128xf32>
    %131 = arith.addf %128, %130 : vector<8x128xf32>
    %132 = tpu.iota {dimensions = array<i32: 1>} : vector<8x128xi32>
    %cst_88 = arith.constant dense<0x7F800000> : vector<8xf32>
    %133 = vector.multi_reduction <minimumf>, %131, %cst_88 [1] : vector<8x128xf32> to vector<8xf32>
    %134 = vector.shape_cast %133 : vector<8xf32> to vector<8x1xf32>
    %135 = vector.broadcast %134 : vector<8x1xf32> to vector<8x128xf32>
    %136 = arith.cmpf oeq, %131, %135 : vector<8x128xf32>
    %c128_i32 = arith.constant 128 : i32
    %137 = vector.broadcast %c128_i32 : i32 to vector<8x128xi32>
    %138 = arith.select %136, %132, %137 : vector<8x128xi1>, vector<8x128xi32>
    %cst_89 = arith.constant dense<2147483647> : vector<8xi32>
    %139 = vector.multi_reduction <minsi>, %138, %cst_89 [1] : vector<8x128xi32> to vector<8xi32>
    %140 = vector.shape_cast %139 : vector<8xi32> to vector<8x1xi32>
    %141 = vector.broadcast %140 : vector<8x1xi32> to vector<8x128xi32>
    %142 = arith.cmpi eq, %132, %141 : vector<8x128xi32>
    %143 = arith.extui %142 : vector<8x128xi1> to vector<8x128xi32>
    %144 = arith.sitofp %143 : vector<8x128xi32> to vector<8x128xf32>
    %145 = arith.truncf %144 : vector<8x128xf32> to vector<8x128xbf16>
    %c0_90 = arith.constant 0 : index
    %c0_91 = arith.constant 0 : index
    %146 = vector.load %arg7[%c0_90, %c0_91] : memref<128x128xbf16, #tpu.memory_space<vmem>>, vector<128x128xbf16>
    %cst_92 = arith.constant dense<0.000000e+00> : vector<8x128xf32>
    %147 = tpu.matmul %145, %146, %cst_92 {dimension_numbers = #tpu.dot_dimension_numbers<[1], [0], [0], [1], [0, 0, 1, 1], [], []>} : vector<8x128xbf16>, vector<128x128xbf16>, vector<8x128xf32> -> vector<8x128xf32>
    %cst_93 = arith.constant dense<0.000000e+00> : vector<128xf32>
    %148 = vector.multi_reduction <add>, %144, %cst_93 [0] : vector<8x128xf32> to vector<128xf32>
    %149 = vector.shape_cast %148 : vector<128xf32> to vector<1x128xf32>
    %150 = arith.subf %120, %147 : vector<8x128xf32>
    %151 = arith.mulf %150, %150 : vector<8x128xf32>
    %cst_94 = arith.constant dense<0.000000e+00> : vector<128xf32>
    %152 = vector.multi_reduction <add>, %151, %cst_94 [0] : vector<8x128xf32> to vector<128xf32>
    %153 = vector.shape_cast %152 : vector<128xf32> to vector<1x128xf32>
    %cst_95 = arith.constant dense<0.000000e+00> : vector<1xf32>
    %154 = vector.multi_reduction <add>, %153, %cst_95 [1] : vector<1x128xf32> to vector<1xf32>
    %155 = vector.shape_cast %154 : vector<1xf32> to vector<1x1xf32>
    %cst_96 = arith.constant 2.560000e+02 : f32
    %156 = vector.broadcast %cst_96 : f32 to vector<1x1xf32>
    %157 = arith.divf %155, %156 : vector<1x1xf32>
    %cst_97 = arith.constant 8.000000e+00 : f32
    %158 = vector.broadcast %cst_97 : f32 to vector<1x128xf32>
    %159 = arith.divf %149, %158 : vector<1x128xf32>
    %cst_98 = arith.constant 1.000000e-07 : f32
    %160 = vector.broadcast %cst_98 : f32 to vector<1x128xf32>
    %161 = arith.addf %159, %160 : vector<1x128xf32>
    %162 = math.log %161 : vector<1x128xf32>
    %163 = arith.mulf %159, %162 : vector<1x128xf32>
    %cst_99 = arith.constant dense<0.000000e+00> : vector<1xf32>
    %164 = vector.multi_reduction <add>, %163, %cst_99 [1] : vector<1x128xf32> to vector<1xf32>
    %165 = vector.shape_cast %164 : vector<1xf32> to vector<1x1xf32>
    %cst_100 = arith.constant 0.000000e+00 : f32
    %166 = vector.broadcast %cst_100 : f32 to vector<1x1xf32>
    %167 = arith.subf %166, %165 : vector<1x1xf32>
    %168 = math.exp %167 : vector<1x1xf32>
    %169 = tpu.iota {dimensions = array<i32: 0>} : vector<8x128xi32>
    %170 = tpu.iota {dimensions = array<i32: 1>} : vector<8x128xi32>
    %c0_i32 = arith.constant 0 : i32
    %171 = vector.broadcast %c0_i32 : i32 to vector<8x128xi32>
    %172 = arith.cmpi eq, %169, %171 : vector<8x128xi32>
    %c0_i32_101 = arith.constant 0 : i32
    %173 = vector.broadcast %c0_i32_101 : i32 to vector<8x128xi32>
    %174 = arith.cmpi eq, %170, %173 : vector<8x128xi32>
    %175 = arith.andi %172, %174 : vector<8x128xi1>
    %cst_102 = arith.constant 0.000000e+00 : f32
    %176 = vector.shape_cast %157 : vector<1x1xf32> to vector<1x1xf32>
    %177 = vector.broadcast %176 : vector<1x1xf32> to vector<8x128xf32>
    %178 = vector.broadcast %cst_102 : f32 to vector<8x128xf32>
    %179 = arith.select %175, %177, %178 : vector<8x128xi1>, vector<8x128xf32>
    %c0_i32_103 = arith.constant 0 : i32
    %180 = vector.broadcast %c0_i32_103 : i32 to vector<8x128xi32>
    %181 = arith.cmpi eq, %169, %180 : vector<8x128xi32>
    %c1_i32 = arith.constant 1 : i32
    %182 = vector.broadcast %c1_i32 : i32 to vector<8x128xi32>
    %183 = arith.cmpi eq, %170, %182 : vector<8x128xi32>
    %184 = arith.andi %181, %183 : vector<8x128xi1>
    %cst_104 = arith.constant 0.000000e+00 : f32
    %185 = vector.shape_cast %168 : vector<1x1xf32> to vector<1x1xf32>
    %186 = vector.broadcast %185 : vector<1x1xf32> to vector<8x128xf32>
    %187 = vector.broadcast %cst_104 : f32 to vector<8x128xf32>
    %188 = arith.select %184, %186, %187 : vector<8x128xi1>, vector<8x128xf32>
    %189 = arith.addf %179, %188 : vector<8x128xf32>
    %c0_105 = arith.constant 0 : index
    %c0_106 = arith.constant 0 : index
    %190 = vector.load %arg11[%c0_105, %c0_106] : memref<8x128xf32, #tpu.memory_space<vmem>>, vector<8x128xf32>
    tpu.vector_store %arg11[%c0_105, %c0_106], %189 {strides = array<i32>} : memref<8x128xf32, #tpu.memory_space<vmem>>, vector<8x128xf32>,
    %191 = arith.truncf %147 : vector<8x128xf32> to vector<8x128xbf16>
    %c10 = arith.constant 10 : index
    %c0_107 = arith.constant 0 : index
    %c0_108 = arith.constant 0 : index
    %192 = vector.load %arg1[%c10, %c0_107, %c0_108] : memref<20x128x128xbf16, #tpu.memory_space<vmem>>, vector<1x128x128xbf16>
    %193 = vector.shape_cast %192 : vector<1x128x128xbf16> to vector<128x128xbf16>
    %cst_109 = arith.constant dense<0.000000e+00> : vector<8x128xf32>
    %194 = tpu.matmul %191, %193, %cst_109 {dimension_numbers = #tpu.dot_dimension_numbers<[1], [0], [0], [1], [0, 0, 1, 1], [], []>} : vector<8x128xbf16>, vector<128x128xbf16>, vector<8x128xf32> -> vector<8x128xf32>
    %c10_110 = arith.constant 10 : index
    %c0_111 = arith.constant 0 : index
    %c0_112 = arith.constant 0 : index
    %195 = vector.load %arg2[%c10_110, %c0_111, %c0_112] : memref<20x1x128xf32, #tpu.memory_space<vmem>>, vector<1x1x128xf32>
    %196 = vector.shape_cast %195 : vector<1x1x128xf32> to vector<1x128xf32>
    %197 = vector.broadcast %196 : vector<1x128xf32> to vector<8x128xf32>
    %198 = arith.addf %194, %197 : vector<8x128xf32>
    %cst_113 = arith.constant 0.000000e+00 : f32
    %199 = vector.broadcast %cst_113 : f32 to vector<8x128xf32>
    %200 = arith.maximumf %198, %199 : vector<8x128xf32>
    %201 = arith.truncf %200 : vector<8x128xf32> to vector<8x128xbf16>
    %c11 = arith.constant 11 : index
    %c0_114 = arith.constant 0 : index
    %c0_115 = arith.constant 0 : index
    %202 = vector.load %arg1[%c11, %c0_114, %c0_115] : memref<20x128x128xbf16, #tpu.memory_space<vmem>>, vector<1x128x128xbf16>
    %203 = vector.shape_cast %202 : vector<1x128x128xbf16> to vector<128x128xbf16>
    %cst_116 = arith.constant dense<0.000000e+00> : vector<8x128xf32>
    %204 = tpu.matmul %201, %203, %cst_116 {dimension_numbers = #tpu.dot_dimension_numbers<[1], [0], [0], [1], [0, 0, 1, 1], [], []>} : vector<8x128xbf16>, vector<128x128xbf16>, vector<8x128xf32> -> vector<8x128xf32>
    %c11_117 = arith.constant 11 : index
    %c0_118 = arith.constant 0 : index
    %c0_119 = arith.constant 0 : index
    %205 = vector.load %arg2[%c11_117, %c0_118, %c0_119] : memref<20x1x128xf32, #tpu.memory_space<vmem>>, vector<1x1x128xf32>
    %206 = vector.shape_cast %205 : vector<1x1x128xf32> to vector<1x128xf32>
    %207 = vector.broadcast %206 : vector<1x128xf32> to vector<8x128xf32>
    %208 = arith.addf %204, %207 : vector<8x128xf32>
    %cst_120 = arith.constant 0.000000e+00 : f32
    %209 = vector.broadcast %cst_120 : f32 to vector<8x128xf32>
    %210 = arith.maximumf %208, %209 : vector<8x128xf32>
    %211 = arith.truncf %210 : vector<8x128xf32> to vector<8x128xbf16>
    %c12 = arith.constant 12 : index
    %c0_121 = arith.constant 0 : index
    %c0_122 = arith.constant 0 : index
    %212 = vector.load %arg1[%c12, %c0_121, %c0_122] : memref<20x128x128xbf16, #tpu.memory_space<vmem>>, vector<1x128x128xbf16>
    %213 = vector.shape_cast %212 : vector<1x128x128xbf16> to vector<128x128xbf16>
    %cst_123 = arith.constant dense<0.000000e+00> : vector<8x128xf32>
    %214 = tpu.matmul %211, %213, %cst_123 {dimension_numbers = #tpu.dot_dimension_numbers<[1], [0], [0], [1], [0, 0, 1, 1], [], []>} : vector<8x128xbf16>, vector<128x128xbf16>, vector<8x128xf32> -> vector<8x128xf32>
    %c12_124 = arith.constant 12 : index
    %c0_125 = arith.constant 0 : index
    %c0_126 = arith.constant 0 : index
    %215 = vector.load %arg2[%c12_124, %c0_125, %c0_126] : memref<20x1x128xf32, #tpu.memory_space<vmem>>, vector<1x1x128xf32>
    %216 = vector.shape_cast %215 : vector<1x1x128xf32> to vector<1x128xf32>
    %217 = vector.broadcast %216 : vector<1x128xf32> to vector<8x128xf32>
    %218 = arith.addf %214, %217 : vector<8x128xf32>
    %219 = arith.addf %200, %218 : vector<8x128xf32>
    %220 = arith.truncf %219 : vector<8x128xf32> to vector<8x128xbf16>
    %c13 = arith.constant 13 : index
    %c0_127 = arith.constant 0 : index
    %c0_128 = arith.constant 0 : index
    %221 = vector.load %arg1[%c13, %c0_127, %c0_128] : memref<20x128x128xbf16, #tpu.memory_space<vmem>>, vector<1x128x128xbf16>
    %222 = vector.shape_cast %221 : vector<1x128x128xbf16> to vector<128x128xbf16>
    %cst_129 = arith.constant dense<0.000000e+00> : vector<8x128xf32>
    %223 = tpu.matmul %220, %222, %cst_129 {dimension_numbers = #tpu.dot_dimension_numbers<[1], [0], [0], [1], [0, 0, 1, 1], [], []>} : vector<8x128xbf16>, vector<128x128xbf16>, vector<8x128xf32> -> vector<8x128xf32>
    %c13_130 = arith.constant 13 : index
    %c0_131 = arith.constant 0 : index
    %c0_132 = arith.constant 0 : index
    %224 = vector.load %arg2[%c13_130, %c0_131, %c0_132] : memref<20x1x128xf32, #tpu.memory_space<vmem>>, vector<1x1x128xf32>
    %225 = vector.shape_cast %224 : vector<1x1x128xf32> to vector<1x128xf32>
    %226 = vector.broadcast %225 : vector<1x128xf32> to vector<8x128xf32>
    %227 = arith.addf %223, %226 : vector<8x128xf32>
    %cst_133 = arith.constant 0.000000e+00 : f32
    %228 = vector.broadcast %cst_133 : f32 to vector<8x128xf32>
    %229 = arith.maximumf %227, %228 : vector<8x128xf32>
    %230 = arith.truncf %229 : vector<8x128xf32> to vector<8x128xbf16>
    %c14 = arith.constant 14 : index
    %c0_134 = arith.constant 0 : index
    %c0_135 = arith.constant 0 : index
    %231 = vector.load %arg1[%c14, %c0_134, %c0_135] : memref<20x128x128xbf16, #tpu.memory_space<vmem>>, vector<1x128x128xbf16>
    %232 = vector.shape_cast %231 : vector<1x128x128xbf16> to vector<128x128xbf16>
    %cst_136 = arith.constant dense<0.000000e+00> : vector<8x128xf32>
    %233 = tpu.matmul %230, %232, %cst_136 {dimension_numbers = #tpu.dot_dimension_numbers<[1], [0], [0], [1], [0, 0, 1, 1], [], []>} : vector<8x128xbf16>, vector<128x128xbf16>, vector<8x128xf32> -> vector<8x128xf32>
    %c14_137 = arith.constant 14 : index
    %c0_138 = arith.constant 0 : index
    %c0_139 = arith.constant 0 : index
    %234 = vector.load %arg2[%c14_137, %c0_138, %c0_139] : memref<20x1x128xf32, #tpu.memory_space<vmem>>, vector<1x1x128xf32>
    %235 = vector.shape_cast %234 : vector<1x1x128xf32> to vector<1x128xf32>
    %236 = vector.broadcast %235 : vector<1x128xf32> to vector<8x128xf32>
    %237 = arith.addf %233, %236 : vector<8x128xf32>
    %238 = arith.addf %219, %237 : vector<8x128xf32>
    %239 = arith.truncf %238 : vector<8x128xf32> to vector<8x128xbf16>
    %c0_140 = arith.constant 0 : index
    %c0_141 = arith.constant 0 : index
    %c0_142 = arith.constant 0 : index
    %240 = vector.load %arg5[%c0_140, %c0_141, %c0_142] : memref<2x128x256xbf16, #tpu.memory_space<vmem>>, vector<1x128x256xbf16>
    %241 = vector.shape_cast %240 : vector<1x128x256xbf16> to vector<128x256xbf16>
    %cst_143 = arith.constant dense<0.000000e+00> : vector<8x256xf32>
    %242 = tpu.matmul %239, %241, %cst_143 {dimension_numbers = #tpu.dot_dimension_numbers<[1], [0], [0], [1], [0, 0, 1, 1], [], []>} : vector<8x128xbf16>, vector<128x256xbf16>, vector<8x256xf32> -> vector<8x256xf32>
    %c0_144 = arith.constant 0 : index
    %c0_145 = arith.constant 0 : index
    %c0_146 = arith.constant 0 : index
    %243 = vector.load %arg6[%c0_144, %c0_145, %c0_146] : memref<2x1x256xf32, #tpu.memory_space<vmem>>, vector<1x1x256xf32>
    %244 = vector.shape_cast %243 : vector<1x1x256xf32> to vector<1x256xf32>
    %245 = vector.broadcast %244 : vector<1x256xf32> to vector<8x256xf32>
    %246 = arith.addf %242, %245 : vector<8x256xf32>
    %cst_147 = arith.constant 0.000000e+00 : f32
    %247 = vector.broadcast %cst_147 : f32 to vector<8x256xf32>
    %248 = arith.maximumf %246, %247 : vector<8x256xf32>
    %249 = vector.extract_strided_slice %248 {offsets = [0, 0], sizes = [8, 128], strides = [1, 1]} : vector<8x256xf32> to vector<8x128xf32>
    %250 = vector.extract_strided_slice %248 {offsets = [0, 128], sizes = [8, 128], strides = [1, 1]} : vector<8x256xf32> to vector<8x128xf32>
    %251 = tpu.concatenate %249, %250 in 0 : vector<8x128xf32>, vector<8x128xf32> -> vector<16x128xf32>
    %252 = arith.truncf %251 : vector<16x128xf32> to vector<16x128xbf16>
    %c15 = arith.constant 15 : index
    %c0_148 = arith.constant 0 : index
    %c0_149 = arith.constant 0 : index
    %253 = vector.load %arg1[%c15, %c0_148, %c0_149] : memref<20x128x128xbf16, #tpu.memory_space<vmem>>, vector<1x128x128xbf16>
    %254 = vector.shape_cast %253 : vector<1x128x128xbf16> to vector<128x128xbf16>
    %cst_150 = arith.constant dense<0.000000e+00> : vector<16x128xf32>
    %255 = tpu.matmul %252, %254, %cst_150 {dimension_numbers = #tpu.dot_dimension_numbers<[1], [0], [0], [1], [0, 0, 1, 1], [], []>} : vector<16x128xbf16>, vector<128x128xbf16>, vector<16x128xf32> -> vector<16x128xf32>
    %c15_151 = arith.constant 15 : index
    %c0_152 = arith.constant 0 : index
    %c0_153 = arith.constant 0 : index
    %256 = vector.load %arg2[%c15_151, %c0_152, %c0_153] : memref<20x1x128xf32, #tpu.memory_space<vmem>>, vector<1x1x128xf32>
    %257 = vector.shape_cast %256 : vector<1x1x128xf32> to vector<1x128xf32>
    %258 = vector.broadcast %257 : vector<1x128xf32> to vector<16x128xf32>
    %259 = arith.addf %255, %258 : vector<16x128xf32>
    %cst_154 = arith.constant 0.000000e+00 : f32
    %260 = vector.broadcast %cst_154 : f32 to vector<16x128xf32>
    %261 = arith.maximumf %259, %260 : vector<16x128xf32>
    %262 = arith.truncf %261 : vector<16x128xf32> to vector<16x128xbf16>
    %c16 = arith.constant 16 : index
    %c0_155 = arith.constant 0 : index
    %c0_156 = arith.constant 0 : index
    %263 = vector.load %arg1[%c16, %c0_155, %c0_156] : memref<20x128x128xbf16, #tpu.memory_space<vmem>>, vector<1x128x128xbf16>
    %264 = vector.shape_cast %263 : vector<1x128x128xbf16> to vector<128x128xbf16>
    %cst_157 = arith.constant dense<0.000000e+00> : vector<16x128xf32>
    %265 = tpu.matmul %262, %264, %cst_157 {dimension_numbers = #tpu.dot_dimension_numbers<[1], [0], [0], [1], [0, 0, 1, 1], [], []>} : vector<16x128xbf16>, vector<128x128xbf16>, vector<16x128xf32> -> vector<16x128xf32>
    %c16_158 = arith.constant 16 : index
    %c0_159 = arith.constant 0 : index
    %c0_160 = arith.constant 0 : index
    %266 = vector.load %arg2[%c16_158, %c0_159, %c0_160] : memref<20x1x128xf32, #tpu.memory_space<vmem>>, vector<1x1x128xf32>
    %267 = vector.shape_cast %266 : vector<1x1x128xf32> to vector<1x128xf32>
    %268 = vector.broadcast %267 : vector<1x128xf32> to vector<16x128xf32>
    %269 = arith.addf %265, %268 : vector<16x128xf32>
    %270 = arith.addf %251, %269 : vector<16x128xf32>
    %271 = arith.truncf %270 : vector<16x128xf32> to vector<16x128xbf16>
    %c17 = arith.constant 17 : index
    %c0_161 = arith.constant 0 : index
    %c0_162 = arith.constant 0 : index
    %272 = vector.load %arg1[%c17, %c0_161, %c0_162] : memref<20x128x128xbf16, #tpu.memory_space<vmem>>, vector<1x128x128xbf16>
    %273 = vector.shape_cast %272 : vector<1x128x128xbf16> to vector<128x128xbf16>
    %cst_163 = arith.constant dense<0.000000e+00> : vector<16x128xf32>
    %274 = tpu.matmul %271, %273, %cst_163 {dimension_numbers = #tpu.dot_dimension_numbers<[1], [0], [0], [1], [0, 0, 1, 1], [], []>} : vector<16x128xbf16>, vector<128x128xbf16>, vector<16x128xf32> -> vector<16x128xf32>
    %c17_164 = arith.constant 17 : index
    %c0_165 = arith.constant 0 : index
    %c0_166 = arith.constant 0 : index
    %275 = vector.load %arg2[%c17_164, %c0_165, %c0_166] : memref<20x1x128xf32, #tpu.memory_space<vmem>>, vector<1x1x128xf32>
    %276 = vector.shape_cast %275 : vector<1x1x128xf32> to vector<1x128xf32>
    %277 = vector.broadcast %276 : vector<1x128xf32> to vector<16x128xf32>
    %278 = arith.addf %274, %277 : vector<16x128xf32>
    %cst_167 = arith.constant 0.000000e+00 : f32
    %279 = vector.broadcast %cst_167 : f32 to vector<16x128xf32>
    %280 = arith.maximumf %278, %279 : vector<16x128xf32>
    %281 = arith.truncf %280 : vector<16x128xf32> to vector<16x128xbf16>
    %c18 = arith.constant 18 : index
    %c0_168 = arith.constant 0 : index
    %c0_169 = arith.constant 0 : index
    %282 = vector.load %arg1[%c18, %c0_168, %c0_169] : memref<20x128x128xbf16, #tpu.memory_space<vmem>>, vector<1x128x128xbf16>
    %283 = vector.shape_cast %282 : vector<1x128x128xbf16> to vector<128x128xbf16>
    %cst_170 = arith.constant dense<0.000000e+00> : vector<16x128xf32>
    %284 = tpu.matmul %281, %283, %cst_170 {dimension_numbers = #tpu.dot_dimension_numbers<[1], [0], [0], [1], [0, 0, 1, 1], [], []>} : vector<16x128xbf16>, vector<128x128xbf16>, vector<16x128xf32> -> vector<16x128xf32>
    %c18_171 = arith.constant 18 : index
    %c0_172 = arith.constant 0 : index
    %c0_173 = arith.constant 0 : index
    %285 = vector.load %arg2[%c18_171, %c0_172, %c0_173] : memref<20x1x128xf32, #tpu.memory_space<vmem>>, vector<1x1x128xf32>
    %286 = vector.shape_cast %285 : vector<1x1x128xf32> to vector<1x128xf32>
    %287 = vector.broadcast %286 : vector<1x128xf32> to vector<16x128xf32>
    %288 = arith.addf %284, %287 : vector<16x128xf32>
    %289 = arith.addf %270, %288 : vector<16x128xf32>
    %290 = arith.truncf %289 : vector<16x128xf32> to vector<16x128xbf16>
    %c1_174 = arith.constant 1 : index
    %c0_175 = arith.constant 0 : index
    %c0_176 = arith.constant 0 : index
    %291 = vector.load %arg5[%c1_174, %c0_175, %c0_176] : memref<2x128x256xbf16, #tpu.memory_space<vmem>>, vector<1x128x256xbf16>
    %292 = vector.shape_cast %291 : vector<1x128x256xbf16> to vector<128x256xbf16>
    %cst_177 = arith.constant dense<0.000000e+00> : vector<16x256xf32>
    %293 = tpu.matmul %290, %292, %cst_177 {dimension_numbers = #tpu.dot_dimension_numbers<[1], [0], [0], [1], [0, 0, 1, 1], [], []>} : vector<16x128xbf16>, vector<128x256xbf16>, vector<16x256xf32> -> vector<16x256xf32>
    %c1_178 = arith.constant 1 : index
    %c0_179 = arith.constant 0 : index
    %c0_180 = arith.constant 0 : index
    %294 = vector.load %arg6[%c1_178, %c0_179, %c0_180] : memref<2x1x256xf32, #tpu.memory_space<vmem>>, vector<1x1x256xf32>
    %295 = vector.shape_cast %294 : vector<1x1x256xf32> to vector<1x256xf32>
    %296 = vector.broadcast %295 : vector<1x256xf32> to vector<16x256xf32>
    %297 = arith.addf %293, %296 : vector<16x256xf32>
    %cst_181 = arith.constant 0.000000e+00 : f32
    %298 = vector.broadcast %cst_181 : f32 to vector<16x256xf32>
    %299 = arith.maximumf %297, %298 : vector<16x256xf32>
    %300 = vector.extract_strided_slice %299 {offsets = [0, 0], sizes = [16, 128], strides = [1, 1]} : vector<16x256xf32> to vector<16x128xf32>
    %301 = arith.truncf %300 : vector<16x128xf32> to vector<16x128xbf16>
    %c19 = arith.constant 19 : index
    %c0_182 = arith.constant 0 : index
    %c0_183 = arith.constant 0 : index
    %302 = vector.load %arg1[%c19, %c0_182, %c0_183] : memref<20x128x128xbf16, #tpu.memory_space<vmem>>, vector<1x128x128xbf16>
    %303 = vector.shape_cast %302 : vector<1x128x128xbf16> to vector<128x128xbf16>
    %cst_184 = arith.constant dense<0.000000e+00> : vector<16x128xf32>
    %304 = tpu.matmul %301, %303, %cst_184 {dimension_numbers = #tpu.dot_dimension_numbers<[1], [0], [0], [1], [0, 0, 1, 1], [], []>} : vector<16x128xbf16>, vector<128x128xbf16>, vector<16x128xf32> -> vector<16x128xf32>
    %c19_185 = arith.constant 19 : index
    %c0_186 = arith.constant 0 : index
    %c0_187 = arith.constant 0 : index
    %305 = vector.load %arg2[%c19_185, %c0_186, %c0_187] : memref<20x1x128xf32, #tpu.memory_space<vmem>>, vector<1x1x128xf32>
    %306 = vector.shape_cast %305 : vector<1x1x128xf32> to vector<1x128xf32>
    %307 = vector.broadcast %306 : vector<1x128xf32> to vector<16x128xf32>
    %308 = arith.addf %304, %307 : vector<16x128xf32>
    %c0_188 = arith.constant 0 : index
    %c0_189 = arith.constant 0 : index
    %309 = vector.load %arg10[%c0_188, %c0_189] : memref<32x128xf32, #tpu.memory_space<vmem>>, vector<16x128xf32>
    tpu.vector_store %arg10[%c0_188, %c0_189], %308 {strides = array<i32>} : memref<32x128xf32, #tpu.memory_space<vmem>>, vector<16x128xf32>,
    %310 = vector.extract_strided_slice %299 {offsets = [0, 128], sizes = [16, 128], strides = [1, 1]} : vector<16x256xf32> to vector<16x128xf32>
    %311 = arith.truncf %310 : vector<16x128xf32> to vector<16x128xbf16>
    %c19_190 = arith.constant 19 : index
    %c0_191 = arith.constant 0 : index
    %c0_192 = arith.constant 0 : index
    %312 = vector.load %arg1[%c19_190, %c0_191, %c0_192] : memref<20x128x128xbf16, #tpu.memory_space<vmem>>, vector<1x128x128xbf16>
    %313 = vector.shape_cast %312 : vector<1x128x128xbf16> to vector<128x128xbf16>
    %cst_193 = arith.constant dense<0.000000e+00> : vector<16x128xf32>
    %314 = tpu.matmul %311, %313, %cst_193 {dimension_numbers = #tpu.dot_dimension_numbers<[1], [0], [0], [1], [0, 0, 1, 1], [], []>} : vector<16x128xbf16>, vector<128x128xbf16>, vector<16x128xf32> -> vector<16x128xf32>
    %c19_194 = arith.constant 19 : index
    %c0_195 = arith.constant 0 : index
    %c0_196 = arith.constant 0 : index
    %315 = vector.load %arg2[%c19_194, %c0_195, %c0_196] : memref<20x1x128xf32, #tpu.memory_space<vmem>>, vector<1x1x128xf32>
    %316 = vector.shape_cast %315 : vector<1x1x128xf32> to vector<1x128xf32>
    %317 = vector.broadcast %316 : vector<1x128xf32> to vector<16x128xf32>
    %318 = arith.addf %314, %317 : vector<16x128xf32>
    %c16_197 = arith.constant 16 : index
    %c0_198 = arith.constant 0 : index
    %319 = vector.load %arg10[%c16_197, %c0_198] : memref<32x128xf32, #tpu.memory_space<vmem>>, vector<16x128xf32>
    tpu.vector_store %arg10[%c16_197, %c0_198], %318 {strides = array<i32>} : memref<32x128xf32, #tpu.memory_space<vmem>>, vector<16x128xf32>,
    return
  }
}

</mosaic_0001>

<bundles_post_ra>
// kernel: vqvae_forward.1
= control target key start
LH: loop header
LB: loop body
LE: loop exit
PB: predicated region body
PF: predicated region fallthrough
CT: control target
= control target key end

     0   :  { %17 = vsyncpa [#allocation3], 0  ;;  %s5657_s0 = inlined_call_operand.vmem [shape: f32[32,128], index: 0, kind: input, shape index: {}]   ;;  %s5658_s1 = inlined_call_operand.hbm [shape: bf16[20,128,128], index: 1, kind: input, shape index: {}]   ;;  %s5659_s2 = inlined_call_operand.vmem [shape: f32[20,1,128], index: 2, kind: input, shape index: {}]   ;;  %s5660_s3 = inlined_call_operand.vmem [shape: bf16[2,256,128], index: 3, kind: input, shape index: {}]   ;;  %s5661_s4 = inlined_call_operand.hbm [shape: f32[2,1,128], index: 4, kind: input, shape index: {}]   ;;  %s5662_s5 = inlined_call_operand.hbm [shape: bf16[2,128,256], index: 5, kind: input, shape index: {}]   ;;  %s5663_s6 = inlined_call_operand.vmem [shape: f32[2,1,256], index: 6, kind: input, shape index: {}]   ;;  %s5664_s7 = inlined_call_operand.hbm [shape: bf16[128,128], index: 7, kind: input, shape index: {}]   ;;  %s5665_s8 = inlined_call_operand.hbm [shape: bf16[128,128], index: 8, kind: input, shape index: {}]   ;;  %s5666_s9 = inlined_call_operand.hbm [shape: f32[1,128], index: 9, kind: input, shape index: {}]   ;;  %s5667_s10 = inlined_call_operand.vmem [shape: f32[32,128], index: 10, kind: output, shape index: {0}]   ;;  %s5668_s11 = inlined_call_operand.vmem [shape: f32[8,128], index: 11, kind: output, shape index: {1}]  }
   0x1   :  { %18 = vsyncpa [#allocation5], 0 }
   0x2   :  { %19 = vsyncpa [#allocation8], 0 }
   0x3   :  { %20 = vsyncpa [#allocation11], 0  ;;  %s4996_s17 = smov [#allocation4]   ;;  %s4856_s21 = scalar_lea.hbm %s5661_s4, 32 }
   0x4   :  { %s44_s18 = sshll.u32 %s4996_s17, 4  ;;  %p4857_p0 = scmp.ne.s32.totalorder %s5661_s4, %s4856_s21  ;;  %s45_s18 = int_to_ptr.vmem [resolvable:$true] %s44_s18 }
   0x5   :  { %p4860_p1 = scmp.lt.u32.totalorder %s4856_s21, %s5661_s4 }
   0x7   :  { %p4862_p2 = pnand %p4860_p1, %p4857_p0 }
   0x9   :  { %4865 = shalt.err (!%p4862_p2)
}
   0xa   :  { %s4866_s26 = scalar_lea.vmem %s45_s18, 32  ;;  %p4871_p4 = scmp.lt.s32.totalorder %s45_s18, %s45_s18 }
   0xb   :  { %p4867_p3 = scmp.ne.s32.totalorder %s45_s18, %s4866_s26  ;;  %p4872_p5 = scmp.lt.s32.totalorder %s4866_s26, %s4866_s26 }
   0xd   :  { %p4873_p6 = por %p4872_p5, %p4871_p4 }
   0xf   :  { %p4874_p7 = pnand %p4873_p6, %p4867_p3 }
  0x11   :  { %4877 = shalt.err (!%p4874_p7)
}
  0x12   :  { %s4997_s27 = smov 16   ;;  %s4998_s28 = smov 1  }
  0x13   :  { %50 = dma.hbm_to_vmem [thread:$0]  %s5661_s4, 32, %s45_s18, [#allocation5], %s4997_s27, %s4997_s27, %s4998_s28  }
  0x14   :  { %s4999_s12 = smov [#allocation7]   ;;  %s5000_s14 = smov [#allocation2]  }
  0x15   :  { %s70_s13 = sshll.u32 %s4999_s12, 4  ;;  %s28_s15 = sshll.u32 %s5000_s14, 4  ;;  %s71_s13 = int_to_ptr.vmem [resolvable:$true] %s70_s13  ;;  %s29_s15 = int_to_ptr.vmem [resolvable:$true] %s28_s15 }
  0x16   :  { %s4878_s19 = scalar_lea.hbm %s5664_s7, 1024 }
  0x17   :  { %p4879_p8 = scmp.ne.s32.totalorder %s5664_s7, %s4878_s19  ;;  %p4882_p9 = scmp.lt.u32.totalorder %s4878_s19, %s5664_s7 }
  0x19   :  { %p4884_p10 = pnand %p4882_p9, %p4879_p8 }
  0x1b   :  { %4887 = shalt.err (!%p4884_p10)
}
  0x1c   :  { %s4888_s4 = scalar_lea.vmem %s71_s13, 1024  ;;  %p4893_p12 = scmp.lt.s32.totalorder %s71_s13, %s71_s13 }
  0x1d   :  { %p4889_p11 = scmp.ne.s32.totalorder %s71_s13, %s4888_s4  ;;  %p4894_p13 = scmp.lt.s32.totalorder %s4888_s4, %s4888_s4 }
  0x1f   :  { %p4895_p0 = por %p4894_p13, %p4893_p12 }
  0x21   :  { %p4896_p1 = pnand %p4895_p0, %p4889_p11 }
  0x23   :  { %4899 = shalt.err (!%p4896_p1)
}
  0x24   :  { %s5001_s18 = smov 64   ;;  %s5002_s24 = smov 4  }
  0x25   :  { %76 = dma.hbm_to_vmem [thread:$0]  %s5664_s7, 1024, %s71_s13, [#allocation8], %s5001_s18, %s5001_s18, %s5002_s24  }
  0x26   :  { %s4900_s29 = scalar_lea.hbm %s5658_s1, 20480 }
  0x27   :  { %p4901_p2 = scmp.ne.s32.totalorder %s5658_s1, %s4900_s29  ;;  %p4904_p3 = scmp.lt.u32.totalorder %s4900_s29, %s5658_s1 }
  0x29   :  { %p4906_p4 = pnand %p4904_p3, %p4901_p2 }
  0x2b   :  { %4909 = shalt.err (!%p4906_p4)
}
  0x2c   :  { %s4910_s17 = scalar_lea.vmem %s29_s15, 20480  ;;  %p4915_p6 = scmp.lt.s32.totalorder %s29_s15, %s29_s15 }
  0x2d   :  { %p4911_p5 = scmp.ne.s32.totalorder %s29_s15, %s4910_s17  ;;  %p4916_p7 = scmp.lt.s32.totalorder %s4910_s17, %s4910_s17 }
  0x2f   :  { %p4917_p8 = por %p4916_p7, %p4915_p6 }
  0x31   :  { %p4918_p9 = pnand %p4917_p8, %p4911_p5 }
  0x33   :  { %4921 = shalt.err (!%p4918_p9)
}
  0x34   :  { %34 = dma.hbm_to_vmem [thread:$0]  %s5658_s1, 20480, %s29_s15, [#allocation3], %s5001_s18, %s5001_s18, %s5002_s24  }
  0x35   :  { %s5003_s19 = smov [#allocation6]   ;;  %s4922_s23 = scalar_lea.hbm %s5662_s5, 4096 }
  0x36   :  { %s56_s20 = sshll.u32 %s5003_s19, 4  ;;  %p4923_p10 = scmp.ne.s32.totalorder %s5662_s5, %s4922_s23  ;;  %s57_s20 = int_to_ptr.vmem [resolvable:$true] %s56_s20 }
  0x37   :  { %p4926_p11 = scmp.lt.u32.totalorder %s4922_s23, %s5662_s5 }
  0x39   :  { %p4928_p12 = pnand %p4926_p11, %p4923_p10 }
  0x3b   :  { %4931 = shalt.err (!%p4928_p12)
}
  0x3c   :  { %s4932_s28 = scalar_lea.vmem %s57_s20, 4096  ;;  %p4937_p0 = scmp.lt.s32.totalorder %s57_s20, %s57_s20 }
  0x3d   :  { %p4933_p13 = scmp.ne.s32.totalorder %s57_s20, %s4932_s28  ;;  %p4938_p1 = scmp.lt.s32.totalorder %s4932_s28, %s4932_s28 }
  0x3f   :  { %p4939_p2 = por %p4938_p1, %p4937_p0 }
  0x41   :  { %p4940_p3 = pnand %p4939_p2, %p4933_p13 }
  0x43   :  { %4943 = shalt.err (!%p4940_p3)
}
  0x44   :  { %s5004_s1 = smov 128   ;;  %s5005_s15 = smov 8  }
  0x45   :  { %62 = dma.hbm_to_vmem [thread:$0]  %s5662_s5, 4096, %s57_s20, [#allocation5], %s5004_s1, %s5004_s1, %s5005_s15  }
  0x46   :  { %s5006_s12 = smov [#allocation9]   ;;  %s5007_s16 = smov [#allocation10]  }
  0x47   :  { %s82_s14 = sshll.u32 %s5006_s12, 4  ;;  %s95_s17 = sshll.u32 %s5007_s16, 4  ;;  %s83_s14 = int_to_ptr.vmem [resolvable:$true] %s82_s14  ;;  %s96_s17 = int_to_ptr.vmem [resolvable:$true] %s95_s17 }
  0x48   :  { %s4944_s19 = scalar_lea.hbm %s5665_s8, 1024 }
  0x49   :  { %p4945_p4 = scmp.ne.s32.totalorder %s5665_s8, %s4944_s19  ;;  %p4948_p5 = scmp.lt.u32.totalorder %s4944_s19, %s5665_s8 }
  0x4b   :  { %p4950_p6 = pnand %p4948_p5, %p4945_p4 }
  0x4d   :  { %4953 = shalt.err (!%p4950_p6)
}
  0x4e   :  { %s4954_s5 = scalar_lea.vmem %s83_s14, 1024  ;;  %p4959_p8 = scmp.lt.s32.totalorder %s83_s14, %s83_s14 }
  0x4f   :  { %p4955_p7 = scmp.ne.s32.totalorder %s83_s14, %s4954_s5  ;;  %p4960_p9 = scmp.lt.s32.totalorder %s4954_s5, %s4954_s5 }
  0x51   :  { %p4961_p10 = por %p4960_p9, %p4959_p8 }
  0x53   :  { %p4962_p11 = pnand %p4961_p10, %p4955_p7 }
  0x55   :  { %4965 = shalt.err (!%p4962_p11)
}
  0x56   :  { %88 = dma.hbm_to_vmem [thread:$0]  %s5665_s8, 1024, %s83_s14, [#allocation8], %s5001_s18, %s5001_s18, %s5002_s24  }
  0x57   :  { %s4966_s28 = scalar_lea.hbm %s5666_s9, 16 }
  0x58   :  { %p4967_p12 = scmp.ne.s32.totalorder %s5666_s9, %s4966_s28  ;;  %p4970_p13 = scmp.lt.u32.totalorder %s4966_s28, %s5666_s9 }
  0x5a   :  { %p4972_p0 = pnand %p4970_p13, %p4967_p12 }
  0x5c   :  { %4975 = shalt.err (!%p4972_p0)
}
  0x5d   :  { %s4976_s12 = scalar_lea.vmem %s96_s17, 16  ;;  %s4980_s16 = scalar_lea.vmem %s96_s17, 32 }
  0x5e   :  { %p4977_p1 = scmp.ne.s32.totalorder %s96_s17, %s4976_s12  ;;  %p4981_p2 = scmp.lt.s32.totalorder %s96_s17, %s96_s17 }
  0x5f   :  { %p4982_p3 = scmp.lt.s32.totalorder %s4980_s16, %s4976_s12 }
  0x61   :  { %p4983_p4 = por %p4982_p3, %p4981_p2 }
  0x63   :  { %p4984_p5 = pnand %p4983_p4, %p4977_p1 }
  0x65   :  { %4987 = shalt.err (!%p4984_p5)
}
  0x66   :  { %98 = dma.hbm_to_vmem [thread:$0]  %s5666_s9, 16, %s96_s17, [#allocation11]  }
  0x67   :  { %4988 = dma.done.wait [#allocation3], 20480  }
  0x68   :  { %4989 = vsyncadd [#allocation3], 4294946816 }
  0x69   :  { %4990 = dma.done.wait [#allocation5], 4128  }
  0x6a   :  { %4991 = vsyncadd [#allocation5], 4294963168 }
  0x6b   :  { %4992 = dma.done.wait [#allocation8], 2048  }
  0x6c   :  { %4993 = vsyncadd [#allocation8], 4294965248 }
  0x6d   :  { %4994 = dma.done.wait [#allocation11], 16  }
  0x6e   :  { %4995 = vsyncadd [#allocation11], 4294967280  ;;  %v4588_v0 = vld [vmem:[#allocation2] sm:$0xff]   ;;  %v4589_v1 = vld [vmem:[#allocation2 + $0x8] sm:$0xff]   ;;  %v5008_v31 = vmov 0.0   ;;  %vm5009_vm0 = vmmov 0  }
  0x6f   :  { %4112 = vmatprep.subr.bf16.mxu0 %v4588_v0  ;;  %v4590_v2 = vld [vmem:[#allocation2 + $0x10] sm:$0xff]   ;;  %v4591_v3 = vld [vmem:[#allocation2 + $0x18] sm:$0xff]   ;;  %v118_v4 = vld [vmem:[%s5657_s0] sm:$0xff] }
  0x70   :  { %4113 = vmatpush3.bf16.msra.mxu0 %v4588_v0  ;;  %v119_v5 = vld [vmem:[%s5657_s0 + $0x8] sm:$0xff]  ;;  %v4592_v7 = vld [vmem:[#allocation2 + $0x20] sm:$0xff]   ;;  %v4600_v12 = vld [vmem:[%s5660_s3 + $0x50] sm:$0xff]  }
  0x71   :  { %4114 = vmatprep.subr.bf16.mxu0 %v4589_v1  ;;  %v122_v6 = vpack.c.bf16 %v119_v5, %v118_v4  ;;  %v4596_v8 = vld [vmem:[%s5660_s3 + $0x40] sm:$0xff]   ;;  %v4598_v10 = vld [vmem:[%s5660_s3 + $0x48] sm:$0xff]   ;;  %v4601_v14 = vld [vmem:[%s5660_s3 + $0x10] sm:$0xff]  }
  0x72   :  { %v4597_v9 = vld [vmem:[%s5660_s3] sm:$0xff]   ;;  %3870 = vmatprep.subr.bf16.mxu1 %v4596_v8  ;;  %v4599_v11 = vld [vmem:[%s5660_s3 + $0x8] sm:$0xff]   ;;  %v4602_v15 = vld [vmem:[%s5660_s3 + $0x58] sm:$0xff]  }
  0x73   :  { %4128 = vmatprep.mubr.bf16.mxu0 %v122_v6  ;;  %3871 = vmatpush3.bf16.msra.mxu1 %v4597_v9  ;;  %v4593_v13 = vld [vmem:[#allocation2 + $0x28] sm:$0xff]   ;;  %v4594_v16 = vld [vmem:[#allocation2 + $0x30] sm:$0xff]   ;;  %v4603_v17 = vld [vmem:[%s5660_s3 + $0x18] sm:$0xff]  }
  0x74   :  { %4115 = vmatpush3.bf16.msra.mxu0 %v4589_v1  ;;  %3872 = vmatprep.subr.bf16.mxu1 %v4598_v10  ;;  %v4604_v18 = vld [vmem:[%s5660_s3 + $0x60] sm:$0xff]   ;;  %v4595_v19 = vld [vmem:[#allocation2 + $0x38] sm:$0xff]   ;;  %v4606_v21 = vld [vmem:[%s5660_s3 + $0x68] sm:$0xff]  }
  0x75   :  { %4116 = vmatprep.subr.bf16.mxu0 %v4590_v2  ;;  %v4605_v20 = vld [vmem:[%s5660_s3 + $0x20] sm:$0xff]   ;;  %v120_v22 = vld [vmem:[%s5657_s0 + $0x10] sm:$0xff]  ;;  %v121_v23 = vld [vmem:[%s5657_s0 + $0x18] sm:$0xff] }
  0x76   :  { %v4607_v24 = vld [vmem:[%s5660_s3 + $0x28] sm:$0xff]   ;;  %v123_v25 = vpack.c.bf16 %v121_v23, %v120_v22  ;;  %v4608_v26 = vld [vmem:[%s5660_s3 + $0x70] sm:$0xff]   ;;  %v4610_v28 = vld [vmem:[%s5660_s3 + $0x78] sm:$0xff]  }
  0x77   :  { %3873 = vmatpush3.bf16.msra.mxu1 %v4599_v11  ;;  %v4609_v27 = vld [vmem:[%s5660_s3 + $0x30] sm:$0xff]   ;;  %v4611_v29 = vld [vmem:[%s5660_s3 + $0x38] sm:$0xff]   ;;  %v4612_v30 = vld [vmem:[#allocation2 + $0x40] sm:$0xff]  }
  0x78   :  { %4117 = vmatpush3.bf16.msra.mxu0 %v4590_v2  ;;  %3874 = vmatprep.subr.bf16.mxu1 %v4600_v12  ;;  %v4613_v32 = vld [vmem:[#allocation2 + $0x48] sm:$0xff]   ;;  %v4614_v33 = vld [vmem:[#allocation2 + $0x50] sm:$0xff]   ;;  %v4615_v34 = vld [vmem:[#allocation2 + $0x58] sm:$0xff]  }
  0x79   :  { %4118 = vmatprep.subr.bf16.mxu0 %v4591_v3  ;;  %v4616_v35 = vld [vmem:[#allocation2 + $0x60] sm:$0xff]   ;;  %v4617_v51 = vld [vmem:[#allocation2 + $0x68] sm:$0xff]   ;;  %v4618_v52 = vld [vmem:[#allocation2 + $0x70] sm:$0xff]  }
  0x7a   :  { %v3532_v36 = vld [vmem:[%s5659_s2] ss:$0 sm:$0xff]  ;;  %v4619_v53 = vld [vmem:[#allocation2 + $0x78] sm:$0xff]   ;;  %v4621_v55 = vld [vmem:[#allocation2 + $0x88] sm:$0xff]  }
  0x7b   :  { %3875 = vmatpush3.bf16.msra.mxu1 %v4601_v14  ;;  %v4620_v54 = vld [vmem:[#allocation2 + $0x80] sm:$0xff]   ;;  %v4622_v56 = vld [vmem:[#allocation2 + $0x90] sm:$0xff]   ;;  %v4623_v57 = vld [vmem:[#allocation2 + $0x98] sm:$0xff]  }
  0x7c   :  { %4119 = vmatpush3.bf16.msra.mxu0 %v4591_v3  ;;  %3876 = vmatprep.subr.bf16.mxu1 %v4602_v15  ;;  %v4624_v58 = vld [vmem:[#allocation2 + $0xa0] sm:$0xff]   ;;  %v4625_v59 = vld [vmem:[#allocation2 + $0xa8] sm:$0xff]   ;;  %v4626_v8 = vld [vmem:[#allocation2 + $0xb0] sm:$0xff]  }
  0x7d   :  { %4120 = vmatprep.subr.bf16.mxu0 %v4592_v7  ;;  %v3541_v61 = vld [vmem:[#allocation4] ss:$0 sm:$0xff]  ;;  %v4627_v9 = vld [vmem:[#allocation2 + $0xb8] sm:$0xff]   ;;  %v4629_v11 = vld [vmem:[#allocation2 + $0xc8] sm:$0xff]  }
  0x7e   :  { %v4628_v10 = vld [vmem:[#allocation2 + $0xc0] sm:$0xff]   ;;  %v4630_v12 = vld [vmem:[#allocation2 + $0xd0] sm:$0xff]   ;;  %v4633_v15 = vld [vmem:[#allocation2 + $0xe8] sm:$0xff]  }
  0x7f   :  { %3877 = vmatpush3.bf16.msra.mxu1 %v4603_v17  ;;  %v4632_v14 = vld [vmem:[#allocation2 + $0xe0] sm:$0xff]  }
  0x80   :  { %4121 = vmatpush3.bf16.msra.mxu0 %v4592_v7  ;;  %3878 = vmatprep.subr.bf16.mxu1 %v4604_v18 }
  0x81   :  { %4122 = vmatprep.subr.bf16.mxu0 %v4593_v13 }
  0x83   :  { %3879 = vmatpush3.bf16.msra.mxu1 %v4605_v20 }
  0x84   :  { %4123 = vmatpush3.bf16.msra.mxu0 %v4593_v13  ;;  %3880 = vmatprep.subr.bf16.mxu1 %v4606_v21  ;;  %v4631_v13 = vld [vmem:[#allocation2 + $0xd8] sm:$0xff]  }
  0x85   :  { %4124 = vmatprep.subr.bf16.mxu0 %v4594_v16 }
  0x87   :  { %3881 = vmatpush3.bf16.msra.mxu1 %v4607_v24 }
  0x88   :  { %4125 = vmatpush3.bf16.msra.mxu0 %v4594_v16  ;;  %3882 = vmatprep.subr.bf16.mxu1 %v4608_v26  ;;  %v3559_v16 = vld [vmem:[%s5659_s2 + $0x1] ss:$0 sm:$0xff]  ;;  %v4634_v26 = vld [vmem:[#allocation2 + $0xf0] sm:$0xff]  }
  0x89   :  { %4126 = vmatprep.subr.bf16.mxu0 %v4595_v19 }
  0x8b   :  { %3883 = vmatpush3.bf16.msra.mxu1 %v4609_v27  ;;  %v4635_v27 = vld [vmem:[#allocation2 + $0xf8] sm:$0xff]  }
  0x8c   :  { %4127 = vmatpush3.bf16.msra.mxu0 %v4595_v19  ;;  %3884 = vmatprep.subr.bf16.mxu1 %v4610_v28  ;;  %v4636_v28 = vld [vmem:[#allocation2 + $0x100] sm:$0xff]  }
  0x8d   :  { %4132 = vmatprep.subr.bf16.mxu0 %v5008_v31 }
  0x8f   :  { %4129 = vmatmul.mubr.bf16.vlgmr.msra.gmra.mrb[0].mxu0 %v123_v25  ;;  %3885 = vmatpush3.bf16.msra.mxu1 %v4611_v29  ;;  %v4637_v29 = vld [vmem:[#allocation2 + $0x108] sm:$0xff]  }
  0x90   :  { %4152 = vmatprep.subr.bf16.mxu1 %v5008_v31  ;;  %4133 = vmatpush3.bf16.msra.mxu0 %v4612_v30  ;;  %v4638_v30 = vld [vmem:[#allocation2 + $0x110] sm:$0xff]  }
  0x91   :  { %4134 = vmatprep.subr.bf16.mxu0 %v5008_v31  ;;  %4148 = vmatprep.mubr.msk.bf16.mxu0 %vm5009_vm0, %v5008_v31 }
  0x94   :  { %4135 = vmatpush3.bf16.msra.mxu0 %v4613_v32  ;;  %v4639_v32 = vld [vmem:[#allocation2 + $0x118] sm:$0xff]  }
  0x95   :  { %4136 = vmatprep.subr.bf16.mxu0 %v5008_v31 }
  0x98   :  { %4137 = vmatpush3.bf16.msra.mxu0 %v4614_v33  ;;  %v4640_v33 = vld [vmem:[#allocation2 + $0x120] sm:$0xff]  }
  0x99   :  { %4138 = vmatprep.subr.bf16.mxu0 %v5008_v31 }
  0x9c   :  { %4139 = vmatpush3.bf16.msra.mxu0 %v4615_v34  ;;  %v4641_v34 = vld [vmem:[#allocation2 + $0x128] sm:$0xff]  }
  0x9d   :  { %4140 = vmatprep.subr.bf16.mxu0 %v5008_v31 }
  0xa0   :  { %4141 = vmatpush3.bf16.msra.mxu0 %v4616_v35  ;;  %v3569_v35 = vld [vmem:[%s5659_s2 + $0x2] ss:$0 sm:$0xff] }
  0xa1   :  { %4142 = vmatprep.subr.bf16.mxu0 %v5008_v31 }
  0xa4   :  { %4143 = vmatpush3.bf16.msra.mxu0 %v4617_v51  ;;  %v4648_v51 = vld [vmem:[%s5660_s3 + $0xd0] sm:$0xff]  }
  0xa5   :  { %4144 = vmatprep.subr.bf16.mxu0 %v5008_v31 }
  0xa8   :  { %4145 = vmatpush3.bf16.msra.mxu0 %v4618_v52  ;;  %v4649_v52 = vld [vmem:[%s5660_s3 + $0x90] sm:$0xff]  }
  0xa9   :  { %4146 = vmatprep.subr.bf16.mxu0 %v5008_v31 }
  0xac   :  { %4147 = vmatpush3.bf16.msra.mxu0 %v4619_v53  ;;  %v4650_v53 = vld [vmem:[%s5660_s3 + $0xd8] sm:$0xff]  }
  0xad   :  { %4172 = vmatprep.subr.bf16.mxu0 %v5008_v31 }
 0x162   :  { %v4130_v37 = vpop.f32.mrb[0].mxu0 }
 0x163   :  { %v238_v38 = vadd.f32 %v4130_v37, %v3532_v36  ;;  %v229_v39 = vpop.f32.mrb[1].mxu0 }
 0x164   :  { %v230_v40 = vadd.f32 %v3532_v36, %v229_v39  ;;  %v4131_v41 = vpop.f32.mrb[2].mxu0 }
 0x165   :  { %v241_v42 = vadd.f32 %v4131_v41, %v3532_v36  ;;  %v232_v43 = vpop.f32.mrb[3].mxu0  ;;  %v246_v45 = vmax.f32 %v238_v38, 0.0 }
 0x166   :  { %v233_v44 = vadd.f32 %v3532_v36, %v232_v43  ;;  %v244_v47 = vmax.f32 %v230_v40, 0.0 }
 0x167   :  { %v247_v46 = vmax.f32 %v241_v42, 0.0 }
 0x168   :  { %v245_v48 = vmax.f32 %v233_v44, 0.0 }
 0x169   :  { %v249_v49 = vpack.c.bf16 %v247_v46, %v246_v45  ;;  %v4642_v45 = vld [vmem:[#allocation2 + $0x130] sm:$0xff]   ;;  %v4643_v46 = vld [vmem:[#allocation2 + $0x138] sm:$0xff]  }
 0x16a   :  { %v248_v50 = vpack.c.bf16 %v245_v48, %v244_v47  ;;  %v4644_v47 = vld [vmem:[%s5660_s3 + $0xc0] sm:$0xff]  }
 0x16b   :  { %417 = vmatprep.mubr.bf16.mxu1 %v249_v49  ;;  %v4645_v48 = vld [vmem:[%s5660_s3 + $0x80] sm:$0xff]   ;;  %v4646_v49 = vld [vmem:[%s5660_s3 + $0xc8] sm:$0xff]  }
 0x16c   :  { %418 = vmatmul.mubr.bf16.vlgmr.msra.gmra.mrb[0].mxu1 %v248_v50  ;;  %v4647_v50 = vld [vmem:[%s5660_s3 + $0x88] sm:$0xff]  }
 0x16d   :  { %4168 = vmatprep.mubr.msk.bf16.mxu1 %vm5009_vm0, %v5008_v31  ;;  %4153 = vmatpush3.bf16.msra.mxu1 %v4620_v54  ;;  %v4651_v54 = vld [vmem:[%s5660_s3 + $0x98] sm:$0xff]  }
 0x16e   :  { %4154 = vmatprep.subr.bf16.mxu1 %v5008_v31 }
 0x171   :  { %4155 = vmatpush3.bf16.msra.mxu1 %v4621_v55  ;;  %v4652_v55 = vld [vmem:[%s5660_s3 + $0xe0] sm:$0xff]  }
 0x172   :  { %4156 = vmatprep.subr.bf16.mxu1 %v5008_v31 }
 0x175   :  { %4157 = vmatpush3.bf16.msra.mxu1 %v4622_v56  ;;  %v4653_v56 = vld [vmem:[%s5660_s3 + $0xa0] sm:$0xff]  }
 0x176   :  { %4158 = vmatprep.subr.bf16.mxu1 %v5008_v31 }
 0x179   :  { %4159 = vmatpush3.bf16.msra.mxu1 %v4623_v57  ;;  %v4654_v57 = vld [vmem:[%s5660_s3 + $0xe8] sm:$0xff]  }
 0x17a   :  { %4160 = vmatprep.subr.bf16.mxu1 %v5008_v31 }
 0x17d   :  { %4161 = vmatpush3.bf16.msra.mxu1 %v4624_v58  ;;  %v4655_v58 = vld [vmem:[%s5660_s3 + $0xa8] sm:$0xff]  }
 0x17e   :  { %4162 = vmatprep.subr.bf16.mxu1 %v5008_v31 }
 0x181   :  { %4163 = vmatpush3.bf16.msra.mxu1 %v4625_v59  ;;  %v3579_v59 = vld [vmem:[%s5659_s2 + $0x3] ss:$0 sm:$0xff] }
 0x182   :  { %4164 = vmatprep.subr.bf16.mxu1 %v5008_v31 }
 0x185   :  { %4165 = vmatpush3.bf16.msra.mxu1 %v4626_v8  ;;  %v4659_v8 = vld [vmem:[%s5660_s3 + $0xb8] sm:$0xff]  }
 0x186   :  { %4166 = vmatprep.subr.bf16.mxu1 %v5008_v31 }
 0x189   :  { %4167 = vmatpush3.bf16.msra.mxu1 %v4627_v9  ;;  %v4660_v9 = vld [vmem:[#allocation2 + $0x140] sm:$0xff]  }
 0x18a   :  { %4192 = vmatprep.subr.bf16.mxu1 %v5008_v31 }
 0x23f   :  { %v3886_v60 = vpop.f32.mrb[0].mxu1 }
 0x240   :  { %v3887_v62 = vpop.f32.mrb[1].mxu1 }
 0x241   :  { %v3888_v63 = vadd.f32 %v3887_v62, %v3886_v60  ;;  %v3889_v0 = vpop.f32.mrb[2].mxu1 }
 0x242   :  { %v3890_v1 = vpop.f32.mrb[3].mxu1 }
 0x243   :  { %v5236_v2 = vadd.f32 %v3888_v63, %v3541_v61  ;;  %v3891_v3 = vadd.f32 %v3890_v1, %v3889_v0 }
 0x245   :  { %v5238_v4 = vadd.f32 %v3891_v3, %v3541_v61  ;;  %v426_v5 = vmax.f32 %v5236_v2, 0.0 }
 0x247   :  { %v427_v6 = vmax.f32 %v5238_v4, 0.0 }
 0x249   :  { %v428_v7 = vpack.c.bf16 %v427_v6, %v426_v5 }
 0x24b   :  { %4149 = vmatmul.mubr.bf16.vlgmr.msra.gmra.mrb[4].mxu0 %v428_v7  ;;  %v4658_v7 = vld [vmem:[%s5660_s3 + $0xf8] sm:$0xff]  }
 0x24c   :  { %4188 = vmatprep.mubr.msk.bf16.mxu0 %vm5009_vm0, %v5008_v31  ;;  %4173 = vmatpush3.bf16.msra.mxu0 %v4628_v10  ;;  %v4661_v10 = vld [vmem:[#allocation2 + $0x148] sm:$0xff]  }
 0x24d   :  { %4174 = vmatprep.subr.bf16.mxu0 %v5008_v31 }
 0x250   :  { %4175 = vmatpush3.bf16.msra.mxu0 %v4629_v11  ;;  %v4662_v11 = vld [vmem:[#allocation2 + $0x150] sm:$0xff]  }
 0x251   :  { %4176 = vmatprep.subr.bf16.mxu0 %v5008_v31 }
 0x254   :  { %4177 = vmatpush3.bf16.msra.mxu0 %v4630_v12  ;;  %v4663_v12 = vld [vmem:[#allocation2 + $0x158] sm:$0xff]  }
 0x255   :  { %4178 = vmatprep.subr.bf16.mxu0 %v5008_v31 }
 0x258   :  { %4179 = vmatpush3.bf16.msra.mxu0 %v4631_v13  ;;  %v4664_v13 = vld [vmem:[#allocation2 + $0x160] sm:$0xff]  }
 0x259   :  { %4180 = vmatprep.subr.bf16.mxu0 %v5008_v31 }
 0x25c   :  { %4181 = vmatpush3.bf16.msra.mxu0 %v4632_v14  ;;  %v4665_v14 = vld [vmem:[#allocation2 + $0x168] sm:$0xff]  }
 0x25d   :  { %4182 = vmatprep.subr.bf16.mxu0 %v5008_v31 }
 0x260   :  { %4183 = vmatpush3.bf16.msra.mxu0 %v4633_v15  ;;  %v3589_v15 = vld [vmem:[%s5659_s2 + $0x4] ss:$0 sm:$0xff] }
 0x261   :  { %4184 = vmatprep.subr.bf16.mxu0 %v5008_v31 }
 0x264   :  { %4185 = vmatpush3.bf16.msra.mxu0 %v4634_v26  ;;  %v4666_v26 = vld [vmem:[#allocation2 + $0x170] sm:$0xff]  }
 0x265   :  { %4186 = vmatprep.subr.bf16.mxu0 %v5008_v31 }
 0x268   :  { %4187 = vmatpush3.bf16.msra.mxu0 %v4635_v27  ;;  %v4667_v27 = vld [vmem:[#allocation2 + $0x178] sm:$0xff]  }
 0x269   :  { %3928 = vmatprep.subr.bf16.mxu0 %v4644_v47  ;;  %v4677_v47 = vld [vmem:[#allocation2 + $0x1c8] sm:$0xff]  }
 0x31e   :  { %v536_v17 = vpop.f32.mrb[4].mxu0 }
 0x31f   :  { %v537_v18 = vadd.f32 %v3559_v16, %v536_v17  ;;  %v4150_v19 = vpop.f32.mrb[5].mxu0 }
 0x320   :  { %v539_v20 = vpop.f32.mrb[6].mxu0 }
 0x321   :  { %v540_v21 = vadd.f32 %v3559_v16, %v539_v20  ;;  %v4151_v22 = vpop.f32.mrb[7].mxu0  ;;  %v543_v23 = vmax.f32 %v537_v18, 0.0 }
 0x323   :  { %v544_v24 = vmax.f32 %v540_v21, 0.0 }
 0x325   :  { %v545_v25 = vpack.c.bf16 %v544_v24, %v543_v23 }
 0x327   :  { %4169 = vmatmul.mubr.bf16.vlgmr.msra.gmra.mrb[4].mxu1 %v545_v25 }
 0x328   :  { %4208 = vmatprep.mubr.msk.bf16.mxu1 %vm5009_vm0, %v5008_v31  ;;  %4193 = vmatpush3.bf16.msra.mxu1 %v4636_v28  ;;  %v4668_v28 = vld [vmem:[#allocation2 + $0x180] sm:$0xff]  }
 0x329   :  { %4194 = vmatprep.subr.bf16.mxu1 %v5008_v31 }
 0x32c   :  { %4195 = vmatpush3.bf16.msra.mxu1 %v4637_v29  ;;  %v4669_v29 = vld [vmem:[#allocation2 + $0x188] sm:$0xff]  }
 0x32d   :  { %4196 = vmatprep.subr.bf16.mxu1 %v5008_v31 }
 0x330   :  { %4197 = vmatpush3.bf16.msra.mxu1 %v4638_v30  ;;  %v4670_v30 = vld [vmem:[#allocation2 + $0x190] sm:$0xff]  }
 0x331   :  { %4198 = vmatprep.subr.bf16.mxu1 %v5008_v31 }
 0x334   :  { %4199 = vmatpush3.bf16.msra.mxu1 %v4639_v32  ;;  %v4671_v32 = vld [vmem:[#allocation2 + $0x198] sm:$0xff]  }
 0x335   :  { %4200 = vmatprep.subr.bf16.mxu1 %v5008_v31 }
 0x338   :  { %4201 = vmatpush3.bf16.msra.mxu1 %v4640_v33  ;;  %v4672_v33 = vld [vmem:[#allocation2 + $0x1a0] sm:$0xff]  }
 0x339   :  { %4202 = vmatprep.subr.bf16.mxu1 %v5008_v31 }
 0x33c   :  { %4203 = vmatpush3.bf16.msra.mxu1 %v4641_v34  ;;  %v4673_v34 = vld [vmem:[#allocation2 + $0x1a8] sm:$0xff]  }
 0x33d   :  { %4204 = vmatprep.subr.bf16.mxu1 %v5008_v31 }
 0x340   :  { %4205 = vmatpush3.bf16.msra.mxu1 %v4642_v45  ;;  %v4675_v45 = vld [vmem:[#allocation2 + $0x1b8] sm:$0xff]  }
 0x341   :  { %4206 = vmatprep.subr.bf16.mxu1 %v5008_v31 }
 0x344   :  { %4207 = vmatpush3.bf16.msra.mxu1 %v4643_v46  ;;  %v4676_v46 = vld [vmem:[#allocation2 + $0x1c0] sm:$0xff]  }
 0x345   :  { %4212 = vmatprep.subr.bf16.mxu1 %v5008_v31 }
 0x3fa   :  { %v653_v36 = vpop.f32.mrb[4].mxu1 }
 0x3fb   :  { %v654_v37 = vadd.f32 %v3569_v35, %v653_v36  ;;  %v4170_v38 = vpop.f32.mrb[5].mxu1  ;;  %v3630_v36 = vld [vmem:[#allocation4 + $0x1] ss:$0 sm:$0xff] }
 0x3fc   :  { %v656_v39 = vpop.f32.mrb[6].mxu1 }
 0x3fd   :  { %v657_v40 = vadd.f32 %v3569_v35, %v656_v39  ;;  %v4171_v41 = vpop.f32.mrb[7].mxu1  ;;  %v5273_v42 = vadd.f32 %v654_v37, %v426_v5  ;;  %v4656_v5 = vld [vmem:[%s5660_s3 + $0xf0] sm:$0xff]  }
 0x3ff   :  { %v5277_v43 = vadd.f32 %v657_v40, %v427_v6  ;;  %v4657_v6 = vld [vmem:[%s5660_s3 + $0xb0] sm:$0xff]  }
 0x401   :  { %v662_v44 = vpack.c.bf16 %v5277_v43, %v5273_v42 }
 0x403   :  { %4189 = vmatmul.mubr.bf16.vlgmr.msra.gmra.mrb[8].mxu0 %v662_v44  ;;  %v4674_v44 = vld [vmem:[#allocation2 + $0x1b0] sm:$0xff]  }
 0x404   :  { %3929 = vmatpush3.bf16.msra.mxu0 %v4645_v48  ;;  %v4678_v48 = vld [vmem:[#allocation2 + $0x1d0] sm:$0xff]  }
 0x405   :  { %3930 = vmatprep.subr.bf16.mxu0 %v4646_v49  ;;  %v4679_v49 = vld [vmem:[#allocation2 + $0x1d8] sm:$0xff]  }
 0x408   :  { %3931 = vmatpush3.bf16.msra.mxu0 %v4647_v50  ;;  %v4680_v50 = vld [vmem:[#allocation2 + $0x1e0] sm:$0xff]  }
 0x409   :  { %3932 = vmatprep.subr.bf16.mxu0 %v4648_v51  ;;  %v4681_v51 = vld [vmem:[#allocation2 + $0x1e8] sm:$0xff]  }
 0x40c   :  { %3933 = vmatpush3.bf16.msra.mxu0 %v4649_v52  ;;  %v3648_v52 = vld [vmem:[%s5659_s2 + $0x5] ss:$0 sm:$0xff] }
 0x40d   :  { %3934 = vmatprep.subr.bf16.mxu0 %v4650_v53 }
 0x410   :  { %3935 = vmatpush3.bf16.msra.mxu0 %v4651_v54 }
 0x411   :  { %3936 = vmatprep.subr.bf16.mxu0 %v4652_v55 }
 0x414   :  { %3937 = vmatpush3.bf16.msra.mxu0 %v4653_v56 }
 0x415   :  { %3938 = vmatprep.subr.bf16.mxu0 %v4654_v57 }
 0x418   :  { %3939 = vmatpush3.bf16.msra.mxu0 %v4655_v58 }
 0x419   :  { %3940 = vmatprep.subr.bf16.mxu0 %v4656_v5 }
 0x41c   :  { %3941 = vmatpush3.bf16.msra.mxu0 %v4657_v6 }
 0x41d   :  { %3942 = vmatprep.subr.bf16.mxu0 %v4658_v7 }
 0x420   :  { %3943 = vmatpush3.bf16.msra.mxu0 %v4659_v8 }
 0x421   :  { %4232 = vmatprep.subr.bf16.mxu0 %v5008_v31 }
 0x4d6   :  { %v770_v60 = vpop.f32.mrb[8].mxu0 }
 0x4d7   :  { %v771_v61 = vadd.f32 %v3579_v59, %v770_v60  ;;  %v4190_v62 = vpop.f32.mrb[9].mxu0  ;;  %v4682_v60 = vld [vmem:[#allocation2 + $0x1f0] sm:$0xff]  }
 0x4d8   :  { %v773_v63 = vpop.f32.mrb[10].mxu0  ;;  %v4684_v62 = vld [vmem:[#allocation2 + $0x200] sm:$0xff]  }
 0x4d9   :  { %v774_v0 = vadd.f32 %v3579_v59, %v773_v63  ;;  %v4191_v1 = vpop.f32.mrb[11].mxu0  ;;  %v777_v2 = vmax.f32 %v771_v61, 0.0  ;;  %v4683_v61 = vld [vmem:[#allocation2 + $0x1f8] sm:$0xff]   ;;  %v4685_v63 = vld [vmem:[#allocation2 + $0x208] sm:$0xff]  }
 0x4da   :  { %v4687_v1 = vld [vmem:[#allocation2 + $0x218] sm:$0xff]  }
 0x4db   :  { %v778_v3 = vmax.f32 %v774_v0, 0.0  ;;  %v4686_v0 = vld [vmem:[#allocation2 + $0x210] sm:$0xff]  }
 0x4dd   :  { %v779_v4 = vpack.c.bf16 %v778_v3, %v777_v2  ;;  %v4688_v2 = vld [vmem:[#allocation2 + $0x220] sm:$0xff]   ;;  %v4689_v3 = vld [vmem:[#allocation2 + $0x228] sm:$0xff]  }
 0x4df   :  { %4209 = vmatmul.mubr.bf16.vlgmr.msra.gmra.mrb[8].mxu1 %v779_v4  ;;  %v3658_v4 = vld [vmem:[%s5659_s2 + $0x6] ss:$0 sm:$0xff] }
 0x4e0   :  { %4228 = vmatprep.mubr.msk.bf16.mxu1 %vm5009_vm0, %v5008_v31  ;;  %4213 = vmatpush3.bf16.msra.mxu1 %v4660_v9 }
 0x4e1   :  { %4214 = vmatprep.subr.bf16.mxu1 %v5008_v31 }
 0x4e4   :  { %4215 = vmatpush3.bf16.msra.mxu1 %v4661_v10 }
 0x4e5   :  { %4216 = vmatprep.subr.bf16.mxu1 %v5008_v31 }
 0x4e8   :  { %4217 = vmatpush3.bf16.msra.mxu1 %v4662_v11 }
 0x4e9   :  { %4218 = vmatprep.subr.bf16.mxu1 %v5008_v31 }
 0x4ec   :  { %4219 = vmatpush3.bf16.msra.mxu1 %v4663_v12  ;;  %v4690_v12 = vld [vmem:[#allocation2 + $0x230] sm:$0xff]  }
 0x4ed   :  { %4220 = vmatprep.subr.bf16.mxu1 %v5008_v31 }
 0x4f0   :  { %4221 = vmatpush3.bf16.msra.mxu1 %v4664_v13  ;;  %v4691_v13 = vld [vmem:[#allocation2 + $0x238] sm:$0xff]  }
 0x4f1   :  { %4222 = vmatprep.subr.bf16.mxu1 %v5008_v31 }
 0x4f4   :  { %4223 = vmatpush3.bf16.msra.mxu1 %v4665_v14  ;;  %v4692_v14 = vld [vmem:[#allocation2 + $0x240] sm:$0xff]  }
 0x4f5   :  { %4224 = vmatprep.subr.bf16.mxu1 %v5008_v31 }
 0x4f8   :  { %4225 = vmatpush3.bf16.msra.mxu1 %v4666_v26 }
 0x4f9   :  { %4226 = vmatprep.subr.bf16.mxu1 %v5008_v31 }
 0x4fc   :  { %4227 = vmatpush3.bf16.msra.mxu1 %v4667_v27 }
 0x4fd   :  { %4252 = vmatprep.subr.bf16.mxu1 %v5008_v31 }
 0x5b2   :  { %v887_v16 = vpop.f32.mrb[8].mxu1 }
 0x5b3   :  { %v888_v17 = vadd.f32 %v3589_v15, %v887_v16  ;;  %v4210_v18 = vpop.f32.mrb[9].mxu1  ;;  %v4694_v16 = vld [vmem:[#allocation2 + $0x250] sm:$0xff]  }
 0x5b4   :  { %v890_v19 = vpop.f32.mrb[10].mxu1  ;;  %v4696_v18 = vld [vmem:[#allocation2 + $0x260] sm:$0xff]  }
 0x5b5   :  { %v891_v20 = vadd.f32 %v3589_v15, %v890_v19  ;;  %v4211_v21 = vpop.f32.mrb[11].mxu1  ;;  %v894_v22 = vadd.f32 %v888_v17, %v5273_v42  ;;  %v4693_v15 = vld [vmem:[#allocation2 + $0x248] sm:$0xff]   ;;  %v4695_v17 = vld [vmem:[#allocation2 + $0x258] sm:$0xff]  }
 0x5b6   :  { %v4697_v19 = vld [vmem:[#allocation2 + $0x268] sm:$0xff]  }
 0x5b7   :  { %v895_v23 = vadd.f32 %v891_v20, %v5277_v43  ;;  %v896_v25 = vpack.c.bf16 %v894_v22, %v894_v22  ;;  %v3668_v20 = vld [vmem:[%s5659_s2 + $0x7] ss:$0 sm:$0xff] }
 0x5b9   :  { %v897_v24 = vpack.c.bf16 %v895_v23, %v895_v23 }
 0x5bb   :  { %1067 = vmatprep.mubr.bf16.mxu0 %v897_v24 }
 0x5bc   :  { %1068 = vmatmul.mubr.bf16.vlgmr.msra.gmra.mrb[12].mxu0 %v896_v25 }
 0x5bd   :  { %4248 = vmatprep.mubr.msk.bf16.mxu0 %vm5009_vm0, %v5008_v31  ;;  %4233 = vmatpush3.bf16.msra.mxu0 %v4668_v28  ;;  %v4698_v28 = vld [vmem:[#allocation2 + $0x270] sm:$0xff]  }
 0x5be   :  { %4234 = vmatprep.subr.bf16.mxu0 %v5008_v31 }
 0x5c1   :  { %4235 = vmatpush3.bf16.msra.mxu0 %v4669_v29  ;;  %v4699_v29 = vld [vmem:[#allocation2 + $0x278] sm:$0xff]  }
 0x5c2   :  { %4236 = vmatprep.subr.bf16.mxu0 %v5008_v31 }
 0x5c5   :  { %4237 = vmatpush3.bf16.msra.mxu0 %v4670_v30  ;;  %v4700_v30 = vld [vmem:[#allocation9] sm:$0xff]  }
 0x5c6   :  { %4238 = vmatprep.subr.bf16.mxu0 %v5008_v31 }
 0x5c9   :  { %4239 = vmatpush3.bf16.msra.mxu0 %v4671_v32  ;;  %v4701_v32 = vld [vmem:[#allocation9 + $0x8] sm:$0xff]  }
 0x5ca   :  { %4240 = vmatprep.subr.bf16.mxu0 %v5008_v31 }
 0x5cd   :  { %4241 = vmatpush3.bf16.msra.mxu0 %v4672_v33  ;;  %v4702_v33 = vld [vmem:[#allocation9 + $0x10] sm:$0xff]  }
 0x5ce   :  { %4242 = vmatprep.subr.bf16.mxu0 %v5008_v31 }
 0x5d1   :  { %4243 = vmatpush3.bf16.msra.mxu0 %v4673_v34  ;;  %v4703_v34 = vld [vmem:[#allocation9 + $0x18] sm:$0xff]  }
 0x5d2   :  { %4244 = vmatprep.subr.bf16.mxu0 %v5008_v31 }
 0x5d5   :  { %4245 = vmatpush3.bf16.msra.mxu0 %v4674_v44 }
 0x5d6   :  { %4246 = vmatprep.subr.bf16.mxu0 %v5008_v31 }
 0x5d9   :  { %4247 = vmatpush3.bf16.msra.mxu0 %v4675_v45 }
 0x5da   :  { %4272 = vmatprep.subr.bf16.mxu0 %v5008_v31 }
 0x68f   :  { %v3944_v35 = vpop.f32.mrb[12].mxu0 }
 0x690   :  { %v3945_v37 = vpop.f32.mrb[13].mxu0 }
 0x691   :  { %v3946_v38 = vadd.f32 %v3945_v37, %v3944_v35  ;;  %v3947_v39 = vpop.f32.mrb[14].mxu0  ;;  %v4704_v35 = vld [vmem:[#allocation9 + $0x20] sm:$0xff]   ;;  %v4706_v37 = vld [vmem:[#allocation9 + $0x30] sm:$0xff]  }
 0x692   :  { %v3948_v40 = vpop.f32.mrb[15].mxu0 }
 0x693   :  { %v1070_v41 = vadd.f32 %v3946_v38, %v3630_v36  ;;  %v4705_v36 = vld [vmem:[#allocation9 + $0x28] sm:$0xff]   ;;  %v3678_v38 = vld [vmem:[%s5659_s2 + $0x8] ss:$0 sm:$0xff] }
 0x695   :  { %v5358_v42 = vmax.f32 %v1070_v41, 0.0 }
 0x697   :  { %v1076_v43 = vpack.c.bf16 %v5358_v42, %v5358_v42 }
 0x699   :  { %4229 = vmatmul.mubr.bf16.vlgmr.msra.gmra.mrb[12].mxu1 %v1076_v43 }
 0x69a   :  { %4268 = vmatprep.mubr.msk.bf16.mxu1 %vm5009_vm0, %v5008_v31  ;;  %4253 = vmatpush3.bf16.msra.mxu1 %v4676_v46  ;;  %v4707_v46 = vld [vmem:[#allocation9 + $0x38] sm:$0xff]  }
 0x69b   :  { %4254 = vmatprep.subr.bf16.mxu1 %v5008_v31 }
 0x69e   :  { %4255 = vmatpush3.bf16.msra.mxu1 %v4677_v47  ;;  %v3688_v47 = vld [vmem:[%s5659_s2 + $0x9] ss:$0 sm:$0xff] }
 0x69f   :  { %4256 = vmatprep.subr.bf16.mxu1 %v5008_v31 }
 0x6a2   :  { %4257 = vmatpush3.bf16.msra.mxu1 %v4678_v48 }
 0x6a3   :  { %4258 = vmatprep.subr.bf16.mxu1 %v5008_v31 }
 0x6a6   :  { %4259 = vmatpush3.bf16.msra.mxu1 %v4679_v49 }
 0x6a7   :  { %4260 = vmatprep.subr.bf16.mxu1 %v5008_v31 }
 0x6aa   :  { %4261 = vmatpush3.bf16.msra.mxu1 %v4680_v50 }
 0x6ab   :  { %4262 = vmatprep.subr.bf16.mxu1 %v5008_v31 }
 0x6ae   :  { %4263 = vmatpush3.bf16.msra.mxu1 %v4681_v51 }
 0x6af   :  { %4264 = vmatprep.subr.bf16.mxu1 %v5008_v31 }
 0x6b2   :  { %4265 = vmatpush3.bf16.msra.mxu1 %v4682_v60 }
 0x6b3   :  { %4266 = vmatprep.subr.bf16.mxu1 %v5008_v31 }
 0x6b6   :  { %4267 = vmatpush3.bf16.msra.mxu1 %v4683_v61 }
 0x6b7   :  { %4292 = vmatprep.subr.bf16.mxu1 %v5008_v31 }
 0x76c   :  { %v1184_v53 = vpop.f32.mrb[12].mxu1 }
 0x76d   :  { %v1185_v54 = vadd.f32 %v3648_v52, %v1184_v53  ;;  %v4230_v55 = vpop.f32.mrb[13].mxu1 }
 0x76e   :  { %v1187_v56 = vpop.f32.mrb[14].mxu1 }
 0x76f   :  { %v1190_v57 = vmax.f32 %v1185_v54, 0.0  ;;  %v4231_v58 = vpop.f32.mrb[15].mxu1 }
 0x771   :  { %v1191_v59 = vpack.c.bf16 %v1190_v57, %v1190_v57  ;;  %v3705_v57 = vld [vmem:[#allocation10] ss:$0 sm:$0xff] }
 0x773   :  { %4249 = vmatmul.mubr.bf16.vlgmr.msra.gmra.mrb[16].mxu0 %v1191_v59 }
 0x774   :  { %4288 = vmatprep.mubr.msk.bf16.mxu0 %vm5009_vm0, %v5008_v31  ;;  %4273 = vmatpush3.bf16.msra.mxu0 %v4684_v62 }
 0x775   :  { %4274 = vmatprep.subr.bf16.mxu0 %v5008_v31 }
 0x778   :  { %4275 = vmatpush3.bf16.msra.mxu0 %v4685_v63  ;;  %v1767_v63 = vlaneseq }
 0x779   :  { %4276 = vmatprep.subr.bf16.mxu0 %v5008_v31 }
 0x77c   :  { %4277 = vmatpush3.bf16.msra.mxu0 %v4686_v0  ;;  %v5436_v0 = vand.u32 127, %v1767_v63 }
 0x77d   :  { %4278 = vmatprep.subr.bf16.mxu0 %v5008_v31 }
 0x77e   :  { %vm1930_vm6 = vcmp.eq.s32.totalorder %v5436_v0, 1  ;;  %vm1927_vm7 = vcmp.eq.s32.totalorder %v5436_v0, 0 }
 0x780   :  { %4279 = vmatpush3.bf16.msra.mxu0 %v4687_v1 }
 0x781   :  { %4280 = vmatprep.subr.bf16.mxu0 %v5008_v31 }
 0x784   :  { %4281 = vmatpush3.bf16.msra.mxu0 %v4688_v2 }
 0x785   :  { %4282 = vmatprep.subr.bf16.mxu0 %v5008_v31 }
 0x788   :  { %4283 = vmatpush3.bf16.msra.mxu0 %v4689_v3 }
 0x789   :  { %4284 = vmatprep.subr.bf16.mxu0 %v5008_v31 }
 0x78c   :  { %4285 = vmatpush3.bf16.msra.mxu0 %v4690_v12 }
 0x78d   :  { %4286 = vmatprep.subr.bf16.mxu0 %v5008_v31 }
 0x790   :  { %4287 = vmatpush3.bf16.msra.mxu0 %v4691_v13 }
 0x791   :  { %4312 = vmatprep.subr.bf16.mxu0 %v5008_v31 }
 0x846   :  { %v1299_v5 = vpop.f32.mrb[16].mxu0 }
 0x847   :  { %v1300_v6 = vadd.f32 %v3658_v4, %v1299_v5  ;;  %v4250_v7 = vpop.f32.mrb[17].mxu0  ;;  %v4708_v5 = vld [vmem:[#allocation7] sm:$0xff]  }
 0x848   :  { %v1302_v8 = vpop.f32.mrb[18].mxu0  ;;  %v4710_v7 = vld [vmem:[#allocation7 + $0x10] sm:$0xff]  }
 0x849   :  { %v5389_v9 = vadd.f32 %v1300_v6, %v5358_v42  ;;  %v4251_v10 = vpop.f32.mrb[19].mxu0  ;;  %v4709_v6 = vld [vmem:[#allocation7 + $0x8] sm:$0xff]   ;;  %v4711_v8 = vld [vmem:[#allocation7 + $0x18] sm:$0xff]  }
 0x84a   :  { %v4713_v10 = vld [vmem:[#allocation7 + $0x28] sm:$0xff]  }
 0x84b   :  { %v1306_v11 = vpack.c.bf16 %v5389_v9, %v5389_v9 }
 0x84d   :  { %4269 = vmatmul.mubr.bf16.vlgmr.msra.gmra.mrb[16].mxu1 %v1306_v11  ;;  %v4714_v11 = vld [vmem:[#allocation7 + $0x30] sm:$0xff]  }
 0x84e   :  { %4308 = vmatprep.mubr.msk.bf16.mxu1 %vm5009_vm0, %v5008_v31  ;;  %4293 = vmatpush3.bf16.msra.mxu1 %v4692_v14 }
 0x84f   :  { %4294 = vmatprep.subr.bf16.mxu1 %v5008_v31 }
 0x852   :  { %4295 = vmatpush3.bf16.msra.mxu1 %v4693_v15 }
 0x853   :  { %4296 = vmatprep.subr.bf16.mxu1 %v5008_v31 }
 0x856   :  { %4297 = vmatpush3.bf16.msra.mxu1 %v4694_v16  ;;  %v4715_v16 = vld [vmem:[#allocation7 + $0x38] sm:$0xff]  }
 0x857   :  { %4298 = vmatprep.subr.bf16.mxu1 %v5008_v31 }
 0x85a   :  { %4299 = vmatpush3.bf16.msra.mxu1 %v4695_v17 }
 0x85b   :  { %4300 = vmatprep.subr.bf16.mxu1 %v5008_v31 }
 0x85e   :  { %4301 = vmatpush3.bf16.msra.mxu1 %v4696_v18 }
 0x85f   :  { %4302 = vmatprep.subr.bf16.mxu1 %v5008_v31 }
 0x862   :  { %4303 = vmatpush3.bf16.msra.mxu1 %v4697_v19 }
 0x863   :  { %4304 = vmatprep.subr.bf16.mxu1 %v5008_v31 }
 0x866   :  { %4305 = vmatpush3.bf16.msra.mxu1 %v4698_v28 }
 0x867   :  { %4306 = vmatprep.subr.bf16.mxu1 %v5008_v31 }
 0x86a   :  { %4307 = vmatpush3.bf16.msra.mxu1 %v4699_v29 }
 0x86b   :  { %4332 = vmatprep.subr.bf16.mxu1 %v5008_v31 }
 0x920   :  { %v1414_v21 = vpop.f32.mrb[16].mxu1 }
 0x921   :  { %v1415_v22 = vadd.f32 %v3668_v20, %v1414_v21  ;;  %v4270_v23 = vpop.f32.mrb[17].mxu1 }
 0x922   :  { %v1417_v24 = vpop.f32.mrb[18].mxu1 }
 0x923   :  { %v1420_v25 = vmax.f32 %v1415_v22, 0.0  ;;  %v4271_v26 = vpop.f32.mrb[19].mxu1  ;;  %v5010_v24 = vmov 1.0|1.0  }
 0x925   :  { %v1421_v27 = vpack.c.bf16 %v1420_v25, %v1420_v25 }
 0x927   :  { %4289 = vmatmul.mubr.bf16.vlgmr.msra.gmra.mrb[20].mxu0 %v1421_v27 }
 0x928   :  { %4328 = vmatprep.mubr.msk.bf16.mxu0 %vm5009_vm0, %v5008_v31  ;;  %4313 = vmatpush3.bf16.msra.mxu0 %v4700_v30 }
 0x929   :  { %4314 = vmatprep.subr.bf16.mxu0 %v5008_v31 }
 0x92c   :  { %4315 = vmatpush3.bf16.msra.mxu0 %v4701_v32 }
 0x92d   :  { %4316 = vmatprep.subr.bf16.mxu0 %v5008_v31 }
 0x930   :  { %4317 = vmatpush3.bf16.msra.mxu0 %v4702_v33 }
 0x931   :  { %4318 = vmatprep.subr.bf16.mxu0 %v5008_v31 }
 0x934   :  { %4319 = vmatpush3.bf16.msra.mxu0 %v4703_v34 }
 0x935   :  { %4320 = vmatprep.subr.bf16.mxu0 %v5008_v31 }
 0x938   :  { %4321 = vmatpush3.bf16.msra.mxu0 %v4704_v35 }
 0x939   :  { %4322 = vmatprep.subr.bf16.mxu0 %v5008_v31 }
 0x93c   :  { %4323 = vmatpush3.bf16.msra.mxu0 %v4705_v36  ;;  %v4716_v36 = vld [vmem:[#allocation2 + $0x280] sm:$0xff]  }
 0x93d   :  { %4324 = vmatprep.subr.bf16.mxu0 %v5008_v31 }
 0x940   :  { %4325 = vmatpush3.bf16.msra.mxu0 %v4706_v37  ;;  %v4717_v37 = vld [vmem:[#allocation2 + $0x288] sm:$0xff]  }
 0x941   :  { %4326 = vmatprep.subr.bf16.mxu0 %v5008_v31 }
 0x944   :  { %4327 = vmatpush3.bf16.msra.mxu0 %v4707_v46 }
 0x945   :  { %4352 = vmatprep.subr.bf16.mxu0 %v5008_v31 }
 0x9fa   :  { %v1529_v39 = vpop.f32.mrb[20].mxu0 }
 0x9fb   :  { %v1530_v40 = vadd.f32 %v3678_v38, %v1529_v39  ;;  %v4290_v41 = vpop.f32.mrb[21].mxu0  ;;  %v4718_v38 = vld [vmem:[#allocation2 + $0x290] sm:$0xff]   ;;  %v4719_v39 = vld [vmem:[#allocation2 + $0x298] sm:$0xff]  }
 0x9fc   :  { %v1532_v42 = vpop.f32.mrb[22].mxu0  ;;  %v4721_v41 = vld [vmem:[#allocation2 + $0x2a8] sm:$0xff]  }
 0x9fd   :  { %v1535_v43 = vadd.f32 %v1530_v40, %v5389_v9  ;;  %v4291_v44 = vpop.f32.mrb[23].mxu0  ;;  %v4712_v9 = vld [vmem:[#allocation7 + $0x20] sm:$0xff]   ;;  %v4722_v42 = vld [vmem:[#allocation2 + $0x2b0] sm:$0xff]  }
 0x9fe   :  { %v4720_v40 = vld [vmem:[#allocation2 + $0x2a0] sm:$0xff]  }
 0x9ff   :  { %v1536_v45 = vpack.c.bf16 %v1535_v43, %v1535_v43  ;;  %v4723_v43 = vld [vmem:[#allocation2 + $0x2b8] sm:$0xff]  }
 0xa01   :  { %4309 = vmatmul.mubr.bf16.vlgmr.msra.gmra.mrb[20].mxu1 %v1536_v45 }
 0xa02   :  { %4348 = vmatprep.mubr.msk.bf16.mxu1 %vm5009_vm0, %v5008_v31  ;;  %4333 = vmatpush3.bf16.msra.mxu1 %v4708_v5  ;;  %v4734_v5 = vld [vmem:[#allocation2 + $0x310] sm:$0xff]  }
 0xa03   :  { %4334 = vmatprep.subr.bf16.mxu1 %v5008_v31 }
 0xa06   :  { %4335 = vmatpush3.bf16.msra.mxu1 %v4709_v6  ;;  %v4735_v6 = vld [vmem:[#allocation2 + $0x318] sm:$0xff]  }
 0xa07   :  { %4336 = vmatprep.subr.bf16.mxu1 %v5008_v31 }
 0xa0a   :  { %4337 = vmatpush3.bf16.msra.mxu1 %v4710_v7  ;;  %v4736_v7 = vld [vmem:[#allocation2 + $0x320] sm:$0xff]  }
 0xa0b   :  { %4338 = vmatprep.subr.bf16.mxu1 %v5008_v31 }
 0xa0e   :  { %4339 = vmatpush3.bf16.msra.mxu1 %v4711_v8  ;;  %v4737_v8 = vld [vmem:[#allocation2 + $0x328] sm:$0xff]  }
 0xa0f   :  { %4340 = vmatprep.subr.bf16.mxu1 %v5008_v31 }
 0xa12   :  { %4341 = vmatpush3.bf16.msra.mxu1 %v4712_v9 }
 0xa13   :  { %4342 = vmatprep.subr.bf16.mxu1 %v5008_v31 }
 0xa16   :  { %4343 = vmatpush3.bf16.msra.mxu1 %v4713_v10 }
 0xa17   :  { %4344 = vmatprep.subr.bf16.mxu1 %v5008_v31 }
 0xa1a   :  { %4345 = vmatpush3.bf16.msra.mxu1 %v4714_v11 }
 0xa1b   :  { %4346 = vmatprep.subr.bf16.mxu1 %v5008_v31 }
 0xa1e   :  { %4347 = vmatpush3.bf16.msra.mxu1 %v4715_v16 }
 0xa1f   :  { %4372 = vmatprep.subr.bf16.mxu1 %v5008_v31 }
 0xad4   :  { %v1644_v48 = vpop.f32.mrb[20].mxu1 }
 0xad5   :  { %v5427_v49 = vadd.f32 %v3688_v47, %v1644_v48  ;;  %v4310_v50 = vpop.f32.mrb[21].mxu1 }
 0xad6   :  { %v1647_v51 = vpop.f32.mrb[22].mxu1 }
 0xad7   :  { %v1653_v52 = vpack.c.bf16 %v5427_v49, %v5427_v49  ;;  %v4311_v53 = vpop.f32.mrb[23].mxu1  ;;  %v1650_v54 = vmul.f32 %v5427_v49, %v5427_v49 }
 0xad9   :  { %4329 = vmatmul.mubr.bf16.vlgmr.msra.gmra.mrb[24].mxu0 %v1653_v52  ;;  %1651 = vadd.xlane.f32.xlu0 %v1650_v54 }
 0xada   :  { %4368 = vmatprep.mubr.msk.bf16.mxu0 %vm5009_vm0, %v5008_v31  ;;  %4353 = vmatpush3.bf16.msra.mxu0 %v4716_v36 }
 0xadb   :  { %4354 = vmatprep.subr.bf16.mxu0 %v5008_v31 }
 0xade   :  { %4355 = vmatpush3.bf16.msra.mxu0 %v4717_v37 }
 0xadf   :  { %4356 = vmatprep.subr.bf16.mxu0 %v5008_v31 }
 0xae2   :  { %4357 = vmatpush3.bf16.msra.mxu0 %v4718_v38 }
 0xae3   :  { %4358 = vmatprep.subr.bf16.mxu0 %v5008_v31 }
 0xae6   :  { %4359 = vmatpush3.bf16.msra.mxu0 %v4719_v39 }
 0xae7   :  { %4360 = vmatprep.subr.bf16.mxu0 %v5008_v31 }
 0xaea   :  { %4361 = vmatpush3.bf16.msra.mxu0 %v4720_v40 }
 0xaeb   :  { %4362 = vmatprep.subr.bf16.mxu0 %v5008_v31 }
 0xaee   :  { %4363 = vmatpush3.bf16.msra.mxu0 %v4721_v41 }
 0xaef   :  { %4364 = vmatprep.subr.bf16.mxu0 %v5008_v31 }
 0xaf2   :  { %4365 = vmatpush3.bf16.msra.mxu0 %v4722_v42  ;;  %v4746_v42 = vld [vmem:[#allocation2 + $0x370] sm:$0xff]  }
 0xaf3   :  { %4366 = vmatprep.subr.bf16.mxu0 %v5008_v31 }
 0xaf6   :  { %4367 = vmatpush3.bf16.msra.mxu0 %v4723_v43  ;;  %v4747_v43 = vld [vmem:[#allocation2 + $0x378] sm:$0xff]  }
 0xaf7   :  { %4392 = vmatprep.subr.bf16.mxu0 %v5008_v31 }
 0xb66   :  { %v1652_v55 = vpop.xlane.xlu0 %1651 }
 0xbac   :  { %v1752_v56 = vpop.f32.mrb[24].mxu0 }
 0xbad   :  { %v1758_v58 = vadd.f32 %v1752_v56, %v1652_v55  ;;  %v4330_v59 = vpop.f32.mrb[25].mxu0 }
 0xbae   :  { %v1755_v60 = vpop.f32.mrb[26].mxu0  ;;  %v4725_v59 = vld [vmem:[#allocation2 + $0x2c8] sm:$0xff]  }
 0xbaf   :  { %v4331_v61 = vpop.f32.mrb[27].mxu0  ;;  %v1766_v62 = vadd.f32 %v3705_v57, %v1758_v58  ;;  %v4724_v58 = vld [vmem:[#allocation2 + $0x2c0] sm:$0xff]   ;;  %v4727_v60 = vld [vmem:[#allocation2 + $0x2d8] sm:$0xff]  }
 0xbb0   :  { %v4728_v61 = vld [vmem:[#allocation2 + $0x2e0] sm:$0xff]  }
 0xbb1   :  { %1769 = vmin.xlane.f32.xlu0 %v1766_v62 }
 0xc3e   :  { %v1770_v1 = vpop.xlane.xlu0 %1769 }
 0xc3f   :  { %vm1771_vm1 = vcmp.eq.f32.partialorder %v1766_v62, %v1770_v1  ;;  %v4729_v62 = vld [vmem:[#allocation2 + $0x2e8] sm:$0xff]   ;;  %v4730_v1 = vld [vmem:[#allocation2 + $0x2f0] sm:$0xff]  }
 0xc40   :  { %v1772_v2 = vsel %vm1771_vm1, %v5436_v0, 128 }
 0xc41   :  { %v1774_v3 = vshra.s32 %v1772_v2, 16  ;;  %v1773_v12 = vand.u32 65535, %v1772_v2  ;;  %v4731_v2 = vld [vmem:[#allocation2 + $0x2f8] sm:$0xff]  }
 0xc43   :  { %v1776_v4 = vcvt.s32.f32 %v1774_v3  ;;  %v1775_v14 = vcvt.s32.f32 %v1773_v12  ;;  %v4732_v3 = vld [vmem:[#allocation2 + $0x300] sm:$0xff]   ;;  %v5477_v12 = vshrl.u32 %v1767_v63, 7  ;;  %v3718_v63 = vld [vmem:[%s5659_s2 + $0xa] ss:$0 sm:$0xff] }
 0xc45   :  { %1777 = vmin.xlane.f32.xlu1 %v1776_v4  ;;  %vm1926_vm5 = vcmp.eq.s32.totalorder %v5477_v12, 0 }
 0xc46   :  { %vm1931_vm8 = vmand %vm1926_vm5, %vm1930_vm6 }
 0xc47   :  { %vm1928_vm9 = vmand %vm1926_vm5, %vm1927_vm7 }
 0xcd2   :  { %v1778_v13 = vpop.xlane.xlu1 %1777 }
 0xcd3   :  { %vm1779_vm2 = vcmp.eq.f32.partialorder %v1776_v4, %v1778_v13  ;;  %v1784_v17 = vcvt.f32.s32 %v1778_v13  ;;  %v4733_v4 = vld [vmem:[#allocation2 + $0x308] sm:$0xff]  }
 0xcd4   :  { %v1780_v15 = vsel %vm1779_vm2, %v1775_v14, inf }
 0xcd5   :  { %1781 = vmin.xlane.f32.xlu1 %v1780_v15  ;;  %v1785_v19 = vshll.u32 %v1784_v17, 16 }
 0xd62   :  { %v1782_v18 = vpop.xlane.xlu1 %1781 }
 0xd63   :  { %v1783_v20 = vcvt.f32.s32 %v1782_v18 }
 0xd65   :  { %v1786_v21 = vadd.s32 %v1785_v19, %v1783_v20 }
 0xd67   :  { %vm1787_vm3 = vcmp.eq.s32.totalorder %v5436_v0, %v1786_v21 }
 0xd68   :  { %v3706_v22 = vsel %vm1787_vm3, 1.0, %v5008_v31  ;;  %vm3715_vm4 = vmpackc.low %vm1787_vm3, %vm1787_vm3 }
 0xd69   :  { %v1895_v23 = vrot.slane %v3706_v22, 4  ;;  %4349 = vmatmul.mubr.msk.bf16.vlgmr.msra.gmra.mrb[24].mxu1 %vm3715_vm4, %v5010_v24 }
 0xd6a   :  { %4388 = vmatprep.mubr.msk.bf16.mxu1 %vm5009_vm0, %v5008_v31  ;;  %4373 = vmatpush3.bf16.msra.mxu1 %v4724_v58 }
 0xd6b   :  { %v1896_v25 = vadd.f32 %v3706_v22, %v1895_v23  ;;  %4374 = vmatprep.subr.bf16.mxu1 %v5008_v31 }
 0xd6d   :  { %v1897_v26 = vrot.slane %v1896_v25, 2 }
 0xd6e   :  { %4375 = vmatpush3.bf16.msra.mxu1 %v4725_v59  ;;  %v4754_v59 = vld [vmem:[#allocation2 + $0x3b0] sm:$0xff]  }
 0xd6f   :  { %v1898_v27 = vadd.f32 %v1897_v26, %v1896_v25  ;;  %4376 = vmatprep.subr.bf16.mxu1 %v5008_v31  ;;  %v4738_v25 = vld [vmem:[#allocation2 + $0x330] sm:$0xff]   ;;  %v4739_v26 = vld [vmem:[#allocation2 + $0x338] sm:$0xff]  }
 0xd71   :  { %v1899_v28 = vrot.slane %v1898_v27, 1 }
 0xd73   :  { %v1900_v29 = vadd.f32 %v1899_v28, %v1898_v27  ;;  %v4740_v27 = vld [vmem:[#allocation2 + $0x340] sm:$0xff]   ;;  %v4741_v28 = vld [vmem:[#allocation2 + $0x348] sm:$0xff]  }
 0xd75   :  { %v1914_v30 = vmul.f32 0.125, %v1900_v29  ;;  %v4742_v29 = vld [vmem:[#allocation2 + $0x350] sm:$0xff]  }
 0xd77   :  { %v1915_v32 = vadd.f32 1e-07, %v1914_v30 }
 0xd79   :  { %4852 = vlog2.f32 %v1915_v32  ;;  %v4744_v32 = vld [vmem:[#allocation2 + $0x360] sm:$0xff]  }
 0xd83   :  { %v4853_v33 = vpop.eup %4852 }
 0xd84   :  { %v1917_v34 = vmul.f32 0.6931472, %v4853_v33  ;;  %v4745_v33 = vld [vmem:[#allocation2 + $0x368] sm:$0xff]  }
 0xd86   :  { %v1918_v35 = vmul.f32 %v1917_v34, %v1914_v30  ;;  %v4743_v30 = vld [vmem:[#allocation2 + $0x358] sm:$0xff]   ;;  %v3728_v34 = vld [vmem:[%s5659_s2 + $0xb] ss:$0 sm:$0xff] }
 0xd88   :  { %1919 = vadd.xlane.f32.xlu0 %v1918_v35 }
 0xe15   :  { %v1920_v9 = vpop.xlane.xlu0 %1919 }
 0xe16   :  { %v1921_v10 = vsub.f32 0.0, %v1920_v9  ;;  %v4771_v9 = vld [vmem:[#allocation6 + $0x50] ss:$8 sps:$4 sm:$0xff]  }
 0xe18   :  { %v1922_v11 = vmul.f32 1.442695, %v1921_v10  ;;  %v4776_v10 = vld [vmem:[#allocation6 + $0x64] ss:$8 sps:$4 sm:$0xff]  }
 0xe1a   :  { %4854 = vpow2.f32 %v1922_v11  ;;  %v4774_v11 = vld [vmem:[#allocation6 + $0x60] ss:$8 sps:$4 sm:$0xff]  }
 0xe24   :  { %v4855_v13 = vpop.eup %4854 }
 0xe25   :  { %v1932_v16 = vsel %vm1931_vm8, %v4855_v13, 0.0  ;;  %v3748_v13 = vld [vmem:[%s5659_s2 + $0xd] ss:$0 sm:$0xff] }
 0xe3c   :  { %v1889_v44 = vpop.f32.mrb[24].mxu1 }
 0xe3d   :  { %v1901_v45 = vsub.f32 %v5427_v49, %v1889_v44  ;;  %v1935_v46 = vpack.c.bf16 %v1889_v44, %v1889_v44  ;;  %v4350_v47 = vpop.f32.mrb[25].mxu1  ;;  %v4726_v49 = vld [vmem:[#allocation2 + $0x2d0] sm:$0xff]   ;;  %v4748_v44 = vld [vmem:[#allocation2 + $0x380] sm:$0xff]  }
 0xe3e   :  { %v1892_v48 = vpop.f32.mrb[26].mxu1  ;;  %4377 = vmatpush3.bf16.msra.mxu1 %v4726_v49  ;;  %v4751_v47 = vld [vmem:[#allocation2 + $0x398] sm:$0xff]  }
 0xe3f   :  { %v1902_v50 = vmul.f32 %v1901_v45, %v1901_v45  ;;  %v4351_v51 = vpop.f32.mrb[27].mxu1  ;;  %4369 = vmatmul.mubr.bf16.vlgmr.msra.gmra.mrb[28].mxu0 %v1935_v46  ;;  %4378 = vmatprep.subr.bf16.mxu1 %v5008_v31  ;;  %v4749_v45 = vld [vmem:[#allocation2 + $0x388] sm:$0xff]   ;;  %v4750_v46 = vld [vmem:[#allocation2 + $0x390] sm:$0xff]   ;;  %v4752_v48 = vld [vmem:[#allocation2 + $0x3a0] sm:$0xff]  }
 0xe40   :  { %4408 = vmatprep.mubr.msk.bf16.mxu0 %vm5009_vm0, %v5008_v31  ;;  %4393 = vmatpush3.bf16.msra.mxu0 %v4732_v3  ;;  %v3738_v51 = vld [vmem:[%s5659_s2 + $0xc] ss:$0 sm:$0xff]  ;;  %v4755_v49 = vld [vmem:[#allocation2 + $0x3b8] sm:$0xff]  }
 0xe41   :  { %v1903_v52 = vrot.slane %v1902_v50, 4  ;;  %4394 = vmatprep.subr.bf16.mxu0 %v5008_v31  ;;  %v4762_v3 = vld [vmem:[#allocation6 + $0x20] ss:$8 sps:$4 sm:$0xff]  }
 0xe42   :  { %4379 = vmatpush3.bf16.msra.mxu1 %v4727_v60  ;;  %v4756_v60 = vld [vmem:[#allocation6] ss:$8 sps:$4 sm:$0xff]  }
 0xe43   :  { %v1904_v53 = vadd.f32 %v1903_v52, %v1902_v50  ;;  %4380 = vmatprep.subr.bf16.mxu1 %v5008_v31  ;;  %v4753_v50 = vld [vmem:[#allocation2 + $0x3a8] sm:$0xff]  }
 0xe44   :  { %4395 = vmatpush3.bf16.msra.mxu0 %v4733_v4  ;;  %v4767_v4 = vld [vmem:[#allocation6 + $0x34] ss:$8 sps:$4 sm:$0xff]  }
 0xe45   :  { %v1905_v54 = vrot.slane %v1904_v53, 2  ;;  %4396 = vmatprep.subr.bf16.mxu0 %v5008_v31 }
 0xe46   :  { %4381 = vmatpush3.bf16.msra.mxu1 %v4728_v61  ;;  %v4758_v61 = vld [vmem:[#allocation6 + $0x4] ss:$8 sps:$4 sm:$0xff]  }
 0xe47   :  { %v1906_v55 = vadd.f32 %v1905_v54, %v1904_v53  ;;  %4382 = vmatprep.subr.bf16.mxu1 %v5008_v31 }
 0xe48   :  { %4397 = vmatpush3.bf16.msra.mxu0 %v4734_v5  ;;  %v4765_v5 = vld [vmem:[#allocation6 + $0x30] ss:$8 sps:$4 sm:$0xff]  }
 0xe49   :  { %v1907_v56 = vrot.slane %v1906_v55, 1  ;;  %4398 = vmatprep.subr.bf16.mxu0 %v5008_v31 }
 0xe4a   :  { %4383 = vmatpush3.bf16.msra.mxu1 %v4729_v62  ;;  %v4761_v62 = vld [vmem:[#allocation6 + $0x14] ss:$8 sps:$4 sm:$0xff]  }
 0xe4b   :  { %v1908_v57 = vadd.f32 %v1907_v56, %v1906_v55  ;;  %4384 = vmatprep.subr.bf16.mxu1 %v5008_v31 }
 0xe4c   :  { %4399 = vmatpush3.bf16.msra.mxu0 %v4735_v6  ;;  %v4770_v6 = vld [vmem:[#allocation6 + $0x44] ss:$8 sps:$4 sm:$0xff]  }
 0xe4d   :  { %1909 = vadd.xlane.f32.xlu1 %v1908_v57  ;;  %4400 = vmatprep.subr.bf16.mxu0 %v5008_v31 }
 0xe4e   :  { %4385 = vmatpush3.bf16.msra.mxu1 %v4730_v1  ;;  %v4759_v1 = vld [vmem:[#allocation6 + $0x10] ss:$8 sps:$4 sm:$0xff]  }
 0xe4f   :  { %4386 = vmatprep.subr.bf16.mxu1 %v5008_v31 }
 0xe50   :  { %4401 = vmatpush3.bf16.msra.mxu0 %v4736_v7  ;;  %v4768_v7 = vld [vmem:[#allocation6 + $0x40] ss:$8 sps:$4 sm:$0xff]  }
 0xe51   :  { %4402 = vmatprep.subr.bf16.mxu0 %v5008_v31 }
 0xe52   :  { %4387 = vmatpush3.bf16.msra.mxu1 %v4731_v2  ;;  %v4764_v2 = vld [vmem:[#allocation6 + $0x24] ss:$8 sps:$4 sm:$0xff]  }
 0xe53   :  { %4412 = vmatprep.subr.bf16.mxu1 %v5008_v31 }
 0xe54   :  { %4403 = vmatpush3.bf16.msra.mxu0 %v4737_v8  ;;  %v4773_v8 = vld [vmem:[#allocation6 + $0x54] ss:$8 sps:$4 sm:$0xff]  }
 0xe55   :  { %4404 = vmatprep.subr.bf16.mxu0 %v5008_v31 }
 0xe58   :  { %4405 = vmatpush3.bf16.msra.mxu0 %v4738_v25  ;;  %v4783_v25 = vld [vmem:[#allocation2 + $0x3d8] sm:$0xff]  }
 0xe59   :  { %4406 = vmatprep.subr.bf16.mxu0 %v5008_v31 }
 0xe5c   :  { %4407 = vmatpush3.bf16.msra.mxu0 %v4739_v26  ;;  %v4784_v26 = vld [vmem:[#allocation2 + $0x3e0] sm:$0xff]  }
 0xe5d   :  { %4432 = vmatprep.subr.bf16.mxu0 %v5008_v31 }
 0xeda   :  { %v1910_v14 = vpop.xlane.xlu1 %1909 }
 0xedb   :  { %v1912_v15 = vmul.f32 0.00390625, %v1910_v14 }
 0xedd   :  { %v1929_v17 = vsel %vm1928_vm9, %v1912_v15, 0.0 }
 0xede   :  { %v1933_v18 = vadd.f32 %v1932_v16, %v1929_v17 }
 0xee0   :  { %1934 = vst [vmem:[%s5668_s11] sm:$0xff] %v1933_v18 }
 0xf12   :  { %v2043_v19 = vpop.f32.mrb[28].mxu0 }
 0xf13   :  { %v2044_v20 = vadd.f32 %v3718_v63, %v2043_v19  ;;  %v4370_v21 = vpop.f32.mrb[29].mxu0 }
 0xf14   :  { %v2046_v0 = vpop.f32.mrb[30].mxu0  ;;  %v4777_v21 = vld [vmem:[#allocation6 + $0x70] ss:$8 sps:$4 sm:$0xff]  }
 0xf15   :  { %v5488_v22 = vmax.f32 %v2044_v20, 0.0  ;;  %v4371_v23 = vpop.f32.mrb[31].mxu0  ;;  %v4779_v20 = vld [vmem:[#allocation6 + $0x74] ss:$8 sps:$4 sm:$0xff]   ;;  %v5011_v0 = vmov 0  }
 0xf16   :  { %v4781_v23 = vld [vmem:[#allocation2 + $0x3c8] sm:$0xff]  }
 0xf17   :  { %v2050_v24 = vpack.c.bf16 %v5488_v22, %v5488_v22 }
 0xf19   :  { %4389 = vmatmul.mubr.bf16.vlgmr.msra.gmra.mrb[28].mxu1 %v2050_v24  ;;  %v4782_v24 = vld [vmem:[#allocation2 + $0x3d0] sm:$0xff]  }
 0xf1a   :  { %4428 = vmatprep.mubr.msk.bf16.mxu1 %vm5009_vm0, %v5008_v31  ;;  %4413 = vmatpush3.bf16.msra.mxu1 %v4740_v27  ;;  %v4785_v27 = vld [vmem:[#allocation2 + $0x3e8] sm:$0xff]  }
 0xf1b   :  { %4414 = vmatprep.subr.bf16.mxu1 %v5008_v31 }
 0xf1e   :  { %4415 = vmatpush3.bf16.msra.mxu1 %v4741_v28  ;;  %v3758_v28 = vld [vmem:[%s5659_s2 + $0xe] ss:$0 sm:$0xff] }
 0xf1f   :  { %4416 = vmatprep.subr.bf16.mxu1 %v5008_v31 }
 0xf22   :  { %4417 = vmatpush3.bf16.msra.mxu1 %v4742_v29 }
 0xf23   :  { %4418 = vmatprep.subr.bf16.mxu1 %v5008_v31 }
 0xf26   :  { %4419 = vmatpush3.bf16.msra.mxu1 %v4743_v30 }
 0xf27   :  { %4420 = vmatprep.subr.bf16.mxu1 %v5008_v31 }
 0xf2a   :  { %4421 = vmatpush3.bf16.msra.mxu1 %v4744_v32 }
 0xf2b   :  { %4422 = vmatprep.subr.bf16.mxu1 %v5008_v31 }
 0xf2e   :  { %4423 = vmatpush3.bf16.msra.mxu1 %v4745_v33 }
 0xf2f   :  { %4424 = vmatprep.subr.bf16.mxu1 %v5008_v31 }
 0xf32   :  { %4425 = vmatpush3.bf16.msra.mxu1 %v4746_v42  ;;  %v4791_v42 = vld [vmem:[#allocation2 + $0x418] sm:$0xff]  }
 0xf33   :  { %4426 = vmatprep.subr.bf16.mxu1 %v5008_v31 }
 0xf36   :  { %4427 = vmatpush3.bf16.msra.mxu1 %v4747_v43  ;;  %v4792_v43 = vld [vmem:[#allocation2 + $0x420] sm:$0xff]  }
 0xf37   :  { %2619 = vmatprep.subr.bf16.mxu1 %v4758_v61  ;;  %v4796_v61 = vld [vmem:[#allocation2 + $0x440] sm:$0xff]  }
 0xfec   :  { %v2158_v35 = vpop.f32.mrb[28].mxu1 }
 0xfed   :  { %v2159_v36 = vadd.f32 %v3728_v34, %v2158_v35  ;;  %v4390_v37 = vpop.f32.mrb[29].mxu1 }
 0xfee   :  { %v2161_v38 = vpop.f32.mrb[30].mxu1  ;;  %v4786_v37 = vld [vmem:[#allocation2 + $0x3f0] sm:$0xff]  }
 0xfef   :  { %v2164_v39 = vmax.f32 %v2159_v36, 0.0  ;;  %v4391_v40 = vpop.f32.mrb[31].mxu1  ;;  %v4787_v38 = vld [vmem:[#allocation2 + $0x3f8] sm:$0xff]  }
 0xff0   :  { %v4789_v40 = vld [vmem:[#allocation2 + $0x408] sm:$0xff]  }
 0xff1   :  { %v2165_v41 = vpack.c.bf16 %v2164_v39, %v2164_v39  ;;  %v4788_v39 = vld [vmem:[#allocation2 + $0x400] sm:$0xff]  }
 0xff3   :  { %4409 = vmatmul.mubr.bf16.vlgmr.msra.gmra.mrb[32].mxu0 %v2165_v41  ;;  %v4790_v41 = vld [vmem:[#allocation2 + $0x410] sm:$0xff]  }
 0xff4   :  { %4448 = vmatprep.mubr.msk.bf16.mxu0 %vm5009_vm0, %v5008_v31  ;;  %4433 = vmatpush3.bf16.msra.mxu0 %v4748_v44  ;;  %v4793_v44 = vld [vmem:[#allocation2 + $0x428] sm:$0xff]  }
 0xff5   :  { %4434 = vmatprep.subr.bf16.mxu0 %v5008_v31 }
 0xff8   :  { %4435 = vmatpush3.bf16.msra.mxu0 %v4749_v45  ;;  %v2531_v45 = vsub.s32 0, %v5477_v12 }
 0xff9   :  { %4436 = vmatprep.subr.bf16.mxu0 %v5008_v31 }
 0xffc   :  { %4437 = vmatpush3.bf16.msra.mxu0 %v4750_v46  ;;  %v2527_v46 = vld [vmem:[%s5663_s6] sm:$0x3] }
 0xffd   :  { %4438 = vmatprep.subr.bf16.mxu0 %v5008_v31 }
0x1000   :  { %4439 = vmatpush3.bf16.msra.mxu0 %v4751_v47  ;;  %v2535_v47 = vsub.s32 1, %v5477_v12  ;;  %v3841_v12 = vld [vmem:[%s5659_s2 + $0x13] ss:$0 sm:$0xff] }
0x1001   :  { %4440 = vmatprep.subr.bf16.mxu0 %v5008_v31 }
0x1004   :  { %4441 = vmatpush3.bf16.msra.mxu0 %v4752_v48  ;;  %v2532_v48 = vrot.slane %v2527_v46, %v2531_v45 }
0x1005   :  { %4442 = vmatprep.subr.bf16.mxu0 %v5008_v31 }
0x1008   :  { %4443 = vmatpush3.bf16.msra.mxu0 %v4753_v50  ;;  %v2536_v50 = vrot.slane %v2527_v46, %v2535_v47  ;;  %v4829_v46 = vld [vmem:[#allocation6 + $0xd4] ss:$8 sps:$4 sm:$0xff]  }
0x1009   :  { %4444 = vmatprep.subr.bf16.mxu0 %v5008_v31 }
0x100c   :  { %4445 = vmatpush3.bf16.msra.mxu0 %v4754_v59 }
0x100d   :  { %4446 = vmatprep.subr.bf16.mxu0 %v5008_v31 }
0x1010   :  { %4447 = vmatpush3.bf16.msra.mxu0 %v4755_v49  ;;  %v4794_v49 = vld [vmem:[#allocation2 + $0x430] sm:$0xff]  }
0x1011   :  { %4452 = vmatprep.subr.bf16.mxu0 %v5008_v31 }
0x10c6   :  { %v2273_v52 = vpop.f32.mrb[32].mxu0 }
0x10c7   :  { %v2274_v53 = vadd.f32 %v3738_v51, %v2273_v52  ;;  %v4410_v54 = vpop.f32.mrb[33].mxu0 }
0x10c8   :  { %v2276_v55 = vpop.f32.mrb[34].mxu0 }
0x10c9   :  { %v5518_v56 = vadd.f32 %v2274_v53, %v5488_v22  ;;  %v4411_v57 = vpop.f32.mrb[35].mxu0  ;;  %v4780_v22 = vld [vmem:[#allocation2 + $0x3c0] sm:$0xff]  }
0x10cb   :  { %v2280_v58 = vpack.c.bf16 %v5518_v56, %v5518_v56 }
0x10cd   :  { %4429 = vmatmul.mubr.bf16.vlgmr.msra.gmra.mrb[32].mxu1 %v2280_v58 }
0x10ce   :  { %2620 = vmatpush1.bf16.msra.mxu1 %v4756_v60  ;;  %2651 = vmatprep.mubr.bf16.mxu1 %v5011_v0  ;;  %v4795_v60 = vld [vmem:[#allocation2 + $0x438] sm:$0xff]  }
0x10cf   :  { %2621 = vmatprep.subr.bf16.mxu1 %v4761_v62  ;;  %v4797_v62 = vld [vmem:[#allocation2 + $0x448] sm:$0xff]  }
0x10d2   :  { %2622 = vmatpush1.bf16.msra.mxu1 %v4759_v1  ;;  %v4798_v1 = vld [vmem:[#allocation2 + $0x450] sm:$0xff]  }
0x10d3   :  { %2623 = vmatprep.subr.bf16.mxu1 %v4764_v2  ;;  %v4799_v2 = vld [vmem:[#allocation2 + $0x458] sm:$0xff]  }
0x10d6   :  { %2624 = vmatpush1.bf16.msra.mxu1 %v4762_v3  ;;  %v4800_v3 = vld [vmem:[#allocation2 + $0x460] sm:$0xff]  }
0x10d7   :  { %2625 = vmatprep.subr.bf16.mxu1 %v4767_v4  ;;  %v4801_v4 = vld [vmem:[#allocation2 + $0x468] sm:$0xff]  }
0x10da   :  { %2626 = vmatpush1.bf16.msra.mxu1 %v4765_v5  ;;  %v3784_v5 = vld [vmem:[%s5659_s2 + $0xf] ss:$0 sm:$0xff] }
0x10db   :  { %2627 = vmatprep.subr.bf16.mxu1 %v4770_v6 }
0x10de   :  { %2628 = vmatpush1.bf16.msra.mxu1 %v4768_v7 }
0x10df   :  { %2629 = vmatprep.subr.bf16.mxu1 %v4773_v8 }
0x10e2   :  { %2630 = vmatpush1.bf16.msra.mxu1 %v4771_v9 }
0x10e3   :  { %2631 = vmatprep.subr.bf16.mxu1 %v4776_v10 }
0x10e6   :  { %2632 = vmatpush1.bf16.msra.mxu1 %v4774_v11 }
0x10e7   :  { %2633 = vmatprep.subr.bf16.mxu1 %v4779_v20  ;;  %v4807_v20 = vld [vmem:[#allocation2 + $0x498] sm:$0xff]  }
0x10ea   :  { %2634 = vmatpush1.bf16.msra.mxu1 %v4777_v21  ;;  %v4808_v21 = vld [vmem:[#allocation2 + $0x4a0] sm:$0xff]  }
0x10eb   :  { %4472 = vmatprep.subr.bf16.mxu1 %v5008_v31 }
0x11a0   :  { %v2388_v14 = vpop.f32.mrb[32].mxu1 }
0x11a1   :  { %v2389_v15 = vadd.f32 %v3748_v13, %v2388_v14  ;;  %v4430_v16 = vpop.f32.mrb[33].mxu1 }
0x11a2   :  { %v2391_v17 = vpop.f32.mrb[34].mxu1  ;;  %v4802_v16 = vld [vmem:[#allocation2 + $0x470] sm:$0xff]  }
0x11a3   :  { %v2394_v18 = vmax.f32 %v2389_v15, 0.0  ;;  %v4431_v63 = vpop.f32.mrb[35].mxu1  ;;  %v4803_v17 = vld [vmem:[#allocation2 + $0x478] sm:$0xff]  }
0x11a4   :  { %v4805_v63 = vld [vmem:[#allocation2 + $0x488] sm:$0xff]  }
0x11a5   :  { %v2395_v19 = vpack.c.bf16 %v2394_v18, %v2394_v18  ;;  %v4804_v18 = vld [vmem:[#allocation2 + $0x480] sm:$0xff]  }
0x11a7   :  { %4449 = vmatmul.mubr.bf16.vlgmr.msra.gmra.mrb[36].mxu0 %v2395_v19  ;;  %v4806_v19 = vld [vmem:[#allocation2 + $0x490] sm:$0xff]  }
0x11a8   :  { %4468 = vmatprep.mubr.msk.bf16.mxu0 %vm5009_vm0, %v5008_v31  ;;  %4453 = vmatpush3.bf16.msra.mxu0 %v4780_v22  ;;  %v4809_v22 = vld [vmem:[#allocation2 + $0x4a8] sm:$0xff]  }
0x11a9   :  { %4454 = vmatprep.subr.bf16.mxu0 %v5008_v31 }
0x11ac   :  { %4455 = vmatpush3.bf16.msra.mxu0 %v4781_v23  ;;  %v3794_v23 = vld [vmem:[%s5659_s2 + $0x10] ss:$0 sm:$0xff] }
0x11ad   :  { %4456 = vmatprep.subr.bf16.mxu0 %v5008_v31 }
0x11b0   :  { %4457 = vmatpush3.bf16.msra.mxu0 %v4782_v24 }
0x11b1   :  { %4458 = vmatprep.subr.bf16.mxu0 %v5008_v31 }
0x11b4   :  { %4459 = vmatpush3.bf16.msra.mxu0 %v4783_v25 }
0x11b5   :  { %4460 = vmatprep.subr.bf16.mxu0 %v5008_v31 }
0x11b8   :  { %4461 = vmatpush3.bf16.msra.mxu0 %v4784_v26 }
0x11b9   :  { %4462 = vmatprep.subr.bf16.mxu0 %v5008_v31 }
0x11bc   :  { %4463 = vmatpush3.bf16.msra.mxu0 %v4785_v27 }
0x11bd   :  { %4464 = vmatprep.subr.bf16.mxu0 %v5008_v31 }
0x11c0   :  { %4465 = vmatpush3.bf16.msra.mxu0 %v4786_v37  ;;  %v4814_v37 = vld [vmem:[#allocation6 + $0x84] ss:$8 sps:$4 sm:$0xff]  }
0x11c1   :  { %4466 = vmatprep.subr.bf16.mxu0 %v5008_v31 }
0x11c4   :  { %4467 = vmatpush3.bf16.msra.mxu0 %v4787_v38  ;;  %v4817_v38 = vld [vmem:[#allocation6 + $0x94] ss:$8 sps:$4 sm:$0xff]  }
0x11c5   :  { %4492 = vmatprep.subr.bf16.mxu0 %v5008_v31 }
0x127a   :  { %v2503_v29 = vpop.f32.mrb[36].mxu0 }
0x127b   :  { %v2504_v30 = vadd.f32 %v3758_v28, %v2503_v29  ;;  %v4450_v32 = vpop.f32.mrb[37].mxu0 }
0x127c   :  { %v2506_v33 = vpop.f32.mrb[38].mxu0 }
0x127d   :  { %v2509_v34 = vadd.f32 %v2504_v30, %v5518_v56  ;;  %v4451_v35 = vpop.f32.mrb[39].mxu0 }
0x127e   :  { %v4811_v35 = vld [vmem:[#allocation2 + $0x4b8] sm:$0xff]  }
0x127f   :  { %v2510_v36 = vpack.c.bf16 %v2509_v34, %v2509_v34  ;;  %v4810_v34 = vld [vmem:[#allocation2 + $0x4b0] sm:$0xff]  }
0x1281   :  { %2652 = vmatmul.mubr.bf16.vlgmr.msra.gmra.mrb[36].mxu1 %v2510_v36  ;;  %v4812_v36 = vld [vmem:[#allocation6 + $0x80] ss:$8 sps:$4 sm:$0xff]  }
0x1282   :  { %4488 = vmatprep.mubr.msk.bf16.mxu1 %vm5009_vm0, %v5008_v31  ;;  %4473 = vmatpush3.bf16.msra.mxu1 %v4788_v39  ;;  %v4815_v39 = vld [vmem:[#allocation6 + $0x90] ss:$8 sps:$4 sm:$0xff]  }
0x1283   :  { %4474 = vmatprep.subr.bf16.mxu1 %v5008_v31 }
0x1286   :  { %4475 = vmatpush3.bf16.msra.mxu1 %v4789_v40  ;;  %v4820_v40 = vld [vmem:[#allocation6 + $0xa4] ss:$8 sps:$4 sm:$0xff]  }
0x1287   :  { %4476 = vmatprep.subr.bf16.mxu1 %v5008_v31 }
0x128a   :  { %4477 = vmatpush3.bf16.msra.mxu1 %v4790_v41  ;;  %v4818_v41 = vld [vmem:[#allocation6 + $0xa0] ss:$8 sps:$4 sm:$0xff]  }
0x128b   :  { %4478 = vmatprep.subr.bf16.mxu1 %v5008_v31 }
0x128e   :  { %4479 = vmatpush3.bf16.msra.mxu1 %v4791_v42  ;;  %v4821_v42 = vld [vmem:[#allocation6 + $0xb0] ss:$8 sps:$4 sm:$0xff]  }
0x128f   :  { %4480 = vmatprep.subr.bf16.mxu1 %v5008_v31 }
0x1292   :  { %4481 = vmatpush3.bf16.msra.mxu1 %v4792_v43  ;;  %v4826_v43 = vld [vmem:[#allocation6 + $0xc4] ss:$8 sps:$4 sm:$0xff]  }
0x1293   :  { %4482 = vmatprep.subr.bf16.mxu1 %v5008_v31 }
0x1296   :  { %4483 = vmatpush3.bf16.msra.mxu1 %v4793_v44  ;;  %v4824_v44 = vld [vmem:[#allocation6 + $0xc0] ss:$8 sps:$4 sm:$0xff]  }
0x1297   :  { %4484 = vmatprep.subr.bf16.mxu1 %v5008_v31 }
0x129a   :  { %4485 = vmatpush3.bf16.msra.mxu1 %v4794_v49  ;;  %v4832_v49 = vld [vmem:[#allocation6 + $0xe4] ss:$8 sps:$4 sm:$0xff]  }
0x129b   :  { %4486 = vmatprep.subr.bf16.mxu1 %v5008_v31 }
0x129e   :  { %4487 = vmatpush3.bf16.msra.mxu1 %v4795_v60  ;;  %v4830_v60 = vld [vmem:[#allocation6 + $0xe0] ss:$8 sps:$4 sm:$0xff]  }
0x129f   :  { %4512 = vmatprep.subr.bf16.mxu1 %v5008_v31 }
0x1354   :  { %v2653_v51 = vpop.f32.mrb[36].mxu1 }
0x1355   :  { %v5560_v52 = vadd.f32 %v2653_v51, %v2532_v48  ;;  %v2655_v53 = vpop.f32.mrb[37].mxu1  ;;  %v4827_v48 = vld [vmem:[#allocation6 + $0xd0] ss:$8 sps:$4 sm:$0xff]  }
0x1356   :  { %v5562_v54 = vadd.f32 %v2655_v53, %v2536_v50  ;;  %v2657_v55 = vpop.f32.mrb[38].mxu1  ;;  %v3804_v50 = vld [vmem:[%s5659_s2 + $0x11] ss:$0 sm:$0xff] }
0x1357   :  { %v2660_v56 = vmax.f32 %v5560_v52, 0.0  ;;  %v2658_v57 = vpop.f32.mrb[39].mxu1 }
0x1358   :  { %v2661_v58 = vmax.f32 %v5562_v54, 0.0 }
0x135a   :  { %v2662_v59 = vpack.c.bf16 %v2661_v58, %v2660_v56 }
0x135c   :  { %4469 = vmatmul.mubr.bf16.vlgmr.msra.gmra.mrb[40].mxu0 %v2662_v59 }
0x135d   :  { %4508 = vmatprep.mubr.msk.bf16.mxu0 %vm5009_vm0, %v5008_v31  ;;  %4493 = vmatpush3.bf16.msra.mxu0 %v4796_v61  ;;  %v4835_v61 = vld [vmem:[#allocation6 + $0xf4] ss:$8 sps:$4 sm:$0xff]  }
0x135e   :  { %4494 = vmatprep.subr.bf16.mxu0 %v5008_v31 }
0x1361   :  { %4495 = vmatpush3.bf16.msra.mxu0 %v4797_v62  ;;  %v4833_v62 = vld [vmem:[#allocation6 + $0xf0] ss:$8 sps:$4 sm:$0xff]  }
0x1362   :  { %4496 = vmatprep.subr.bf16.mxu0 %v5008_v31 }
0x1365   :  { %4497 = vmatpush3.bf16.msra.mxu0 %v4798_v1  ;;  %v4836_v1 = vld [vmem:[#allocation2 + $0x4c0] sm:$0xff]  }
0x1366   :  { %4498 = vmatprep.subr.bf16.mxu0 %v5008_v31 }
0x1369   :  { %4499 = vmatpush3.bf16.msra.mxu0 %v4799_v2  ;;  %v4838_v2 = vld [vmem:[#allocation2 + $0x4c8] sm:$0xff]  }
0x136a   :  { %4500 = vmatprep.subr.bf16.mxu0 %v5008_v31 }
0x136d   :  { %4501 = vmatpush3.bf16.msra.mxu0 %v4800_v3  ;;  %v4840_v3 = vld [vmem:[#allocation2 + $0x4d0] sm:$0xff]  }
0x136e   :  { %4502 = vmatprep.subr.bf16.mxu0 %v5008_v31 }
0x1371   :  { %4503 = vmatpush3.bf16.msra.mxu0 %v4801_v4  ;;  %v4842_v4 = vld [vmem:[#allocation2 + $0x4d8] sm:$0xff]  }
0x1372   :  { %4504 = vmatprep.subr.bf16.mxu0 %v5008_v31 }
0x1375   :  { %4505 = vmatpush3.bf16.msra.mxu0 %v4802_v16 }
0x1376   :  { %4506 = vmatprep.subr.bf16.mxu0 %v5008_v31 }
0x1379   :  { %4507 = vmatpush3.bf16.msra.mxu0 %v4803_v17  ;;  %v4837_v17 = vld [vmem:[#allocation2 + $0x4c0] sm:$0xff]  }
0x137a   :  { %3241 = vmatprep.subr.bf16.mxu0 %v4814_v37 }
0x142f   :  { %v2770_v6 = vpop.f32.mrb[40].mxu0 }
0x1430   :  { %v2771_v7 = vadd.f32 %v3784_v5, %v2770_v6  ;;  %v4470_v8 = vpop.f32.mrb[41].mxu0  ;;  %v4846_v6 = vld [vmem:[#allocation2 + $0x4e8] sm:$0xff]  }
0x1431   :  { %v2773_v9 = vpop.f32.mrb[42].mxu0 }
0x1432   :  { %v2774_v10 = vadd.f32 %v3784_v5, %v2773_v9  ;;  %v4471_v11 = vpop.f32.mrb[43].mxu0  ;;  %v2777_v13 = vmax.f32 %v2771_v7, 0.0  ;;  %v4844_v5 = vld [vmem:[#allocation2 + $0x4e0] sm:$0xff]   ;;  %v3814_v7 = vld [vmem:[%s5659_s2 + $0x12] ss:$0 sm:$0xff] }
0x1434   :  { %v2778_v14 = vmax.f32 %v2774_v10, 0.0 }
0x1436   :  { %v2779_v15 = vpack.c.bf16 %v2778_v14, %v2777_v13 }
0x1438   :  { %4489 = vmatmul.mubr.bf16.vlgmr.msra.gmra.mrb[40].mxu1 %v2779_v15 }
0x1439   :  { %4528 = vmatprep.mubr.msk.bf16.mxu1 %vm5009_vm0, %v5008_v31  ;;  %4513 = vmatpush3.bf16.msra.mxu1 %v4804_v18 }
0x143a   :  { %4514 = vmatprep.subr.bf16.mxu1 %v5008_v31 }
0x143d   :  { %4515 = vmatpush3.bf16.msra.mxu1 %v4805_v63  ;;  %v4839_v63 = vld [vmem:[#allocation2 + $0x4c8] sm:$0xff]  }
0x143e   :  { %4516 = vmatprep.subr.bf16.mxu1 %v5008_v31 }
0x1441   :  { %4517 = vmatpush3.bf16.msra.mxu1 %v4806_v19  ;;  %v4841_v19 = vld [vmem:[#allocation2 + $0x4d0] sm:$0xff]  }
0x1442   :  { %4518 = vmatprep.subr.bf16.mxu1 %v5008_v31 }
0x1445   :  { %4519 = vmatpush3.bf16.msra.mxu1 %v4807_v20  ;;  %v4843_v20 = vld [vmem:[#allocation2 + $0x4d8] sm:$0xff]  }
0x1446   :  { %4520 = vmatprep.subr.bf16.mxu1 %v5008_v31 }
0x1449   :  { %4521 = vmatpush3.bf16.msra.mxu1 %v4808_v21  ;;  %v4845_v21 = vld [vmem:[#allocation2 + $0x4e0] sm:$0xff]  }
0x144a   :  { %4522 = vmatprep.subr.bf16.mxu1 %v5008_v31 }
0x144d   :  { %4523 = vmatpush3.bf16.msra.mxu1 %v4809_v22  ;;  %v4847_v22 = vld [vmem:[#allocation2 + $0x4e8] sm:$0xff]  }
0x144e   :  { %4524 = vmatprep.subr.bf16.mxu1 %v5008_v31 }
0x1451   :  { %4525 = vmatpush3.bf16.msra.mxu1 %v4810_v34 }
0x1452   :  { %4526 = vmatprep.subr.bf16.mxu1 %v5008_v31 }
0x1455   :  { %4527 = vmatpush3.bf16.msra.mxu1 %v4811_v35 }
0x1456   :  { %4532 = vmatprep.subr.bf16.mxu1 %v5008_v31 }
0x150b   :  { %v2887_v24 = vpop.f32.mrb[40].mxu1 }
0x150c   :  { %v2888_v25 = vadd.f32 %v3794_v23, %v2887_v24  ;;  %v4490_v26 = vpop.f32.mrb[41].mxu1  ;;  %v4849_v24 = vld [vmem:[#allocation2 + $0x4f0] sm:$0xff]  }
0x150d   :  { %v2890_v27 = vpop.f32.mrb[42].mxu1  ;;  %v4851_v26 = vld [vmem:[#allocation2 + $0x4f8] sm:$0xff]  }
0x150e   :  { %v2891_v28 = vadd.f32 %v3794_v23, %v2890_v27  ;;  %v4491_v29 = vpop.f32.mrb[43].mxu1  ;;  %v5597_v30 = vadd.f32 %v2888_v25, %v2660_v56  ;;  %v4848_v23 = vld [vmem:[#allocation2 + $0x4f0] sm:$0xff]   ;;  %v4850_v25 = vld [vmem:[#allocation2 + $0x4f8] sm:$0xff]   ;;  %v3823_v27 = vld [vmem:[%s5663_s6 + $0x2] sm:$0x3] }
0x150f   :  { %v3158_v29 = vrot.slane %v3823_v27, %v2535_v47 }
0x1510   :  { %v5601_v32 = vadd.f32 %v2891_v28, %v2661_v58  ;;  %v3154_v28 = vrot.slane %v3823_v27, %v2531_v45 }
0x1512   :  { %v2896_v33 = vpack.c.bf16 %v5601_v32, %v5597_v30 }
0x1514   :  { %4509 = vmatmul.mubr.bf16.vlgmr.msra.gmra.mrb[44].mxu0 %v2896_v33 }
0x1515   :  { %3273 = vmatprep.mubr.bf16.mxu0 %v5011_v0  ;;  %3242 = vmatpush1.bf16.msra.mxu0 %v4812_v36  ;;  %v4823_v0 = vld [vmem:[#allocation6 + $0xb4] ss:$8 sps:$4 sm:$0xff]  }
0x1516   :  { %3243 = vmatprep.subr.bf16.mxu0 %v4817_v38 }
0x1519   :  { %3244 = vmatpush1.bf16.msra.mxu0 %v4815_v39 }
0x151a   :  { %3245 = vmatprep.subr.bf16.mxu0 %v4820_v40 }
0x151d   :  { %3246 = vmatpush1.bf16.msra.mxu0 %v4818_v41 }
0x151e   :  { %3247 = vmatprep.subr.bf16.mxu0 %v4823_v0 }
0x1521   :  { %3248 = vmatpush1.bf16.msra.mxu0 %v4821_v42 }
0x1522   :  { %3249 = vmatprep.subr.bf16.mxu0 %v4826_v43 }
0x1525   :  { %3250 = vmatpush1.bf16.msra.mxu0 %v4824_v44 }
0x1526   :  { %3251 = vmatprep.subr.bf16.mxu0 %v4829_v46 }
0x1529   :  { %3252 = vmatpush1.bf16.msra.mxu0 %v4827_v48 }
0x152a   :  { %3253 = vmatprep.subr.bf16.mxu0 %v4832_v49 }
0x152d   :  { %3254 = vmatpush1.bf16.msra.mxu0 %v4830_v60 }
0x152e   :  { %3255 = vmatprep.subr.bf16.mxu0 %v4835_v61 }
0x1531   :  { %3256 = vmatpush1.bf16.msra.mxu0 %v4833_v62 }
0x1532   :  { %4552 = vmatprep.subr.bf16.mxu0 %v5008_v31 }
0x15e7   :  { %v3004_v51 = vpop.f32.mrb[44].mxu0 }
0x15e8   :  { %v3005_v52 = vadd.f32 %v3804_v50, %v3004_v51  ;;  %v4510_v53 = vpop.f32.mrb[45].mxu0 }
0x15e9   :  { %v3007_v54 = vpop.f32.mrb[46].mxu0 }
0x15ea   :  { %v3008_v55 = vadd.f32 %v3804_v50, %v3007_v54  ;;  %v4511_v56 = vpop.f32.mrb[47].mxu0  ;;  %v3011_v57 = vmax.f32 %v3005_v52, 0.0 }
0x15ec   :  { %v3012_v58 = vmax.f32 %v3008_v55, 0.0 }
0x15ee   :  { %v3013_v59 = vpack.c.bf16 %v3012_v58, %v3011_v57 }
0x15f0   :  { %4529 = vmatmul.mubr.bf16.vlgmr.msra.gmra.mrb[44].mxu1 %v3013_v59 }
0x15f1   :  { %4548 = vmatprep.mubr.msk.bf16.mxu1 %vm5009_vm0, %v5008_v31  ;;  %4533 = vmatpush3.bf16.msra.mxu1 %v4836_v1 }
0x15f2   :  { %4534 = vmatprep.subr.bf16.mxu1 %v5008_v31 }
0x15f5   :  { %4535 = vmatpush3.bf16.msra.mxu1 %v4838_v2 }
0x15f6   :  { %4536 = vmatprep.subr.bf16.mxu1 %v5008_v31 }
0x15f9   :  { %4537 = vmatpush3.bf16.msra.mxu1 %v4840_v3 }
0x15fa   :  { %4538 = vmatprep.subr.bf16.mxu1 %v5008_v31 }
0x15fd   :  { %4539 = vmatpush3.bf16.msra.mxu1 %v4842_v4 }
0x15fe   :  { %4540 = vmatprep.subr.bf16.mxu1 %v5008_v31 }
0x1601   :  { %4541 = vmatpush3.bf16.msra.mxu1 %v4844_v5 }
0x1602   :  { %4542 = vmatprep.subr.bf16.mxu1 %v5008_v31 }
0x1605   :  { %4543 = vmatpush3.bf16.msra.mxu1 %v4846_v6 }
0x1606   :  { %4544 = vmatprep.subr.bf16.mxu1 %v5008_v31 }
0x1609   :  { %4545 = vmatpush3.bf16.msra.mxu1 %v4848_v23 }
0x160a   :  { %4546 = vmatprep.subr.bf16.mxu1 %v5008_v31 }
0x160d   :  { %4547 = vmatpush3.bf16.msra.mxu1 %v4850_v25 }
0x16c3   :  { %v3121_v8 = vpop.f32.mrb[44].mxu1 }
0x16c4   :  { %v3122_v9 = vadd.f32 %v3814_v7, %v3121_v8  ;;  %v4530_v10 = vpop.f32.mrb[45].mxu1 }
0x16c5   :  { %v3124_v11 = vpop.f32.mrb[46].mxu1 }
0x16c6   :  { %v3125_v13 = vadd.f32 %v3814_v7, %v3124_v11  ;;  %v4531_v14 = vpop.f32.mrb[47].mxu1  ;;  %v3128_v15 = vadd.f32 %v3122_v9, %v5597_v30 }
0x16c8   :  { %v3129_v16 = vadd.f32 %v3125_v13, %v5601_v32 }
0x16ca   :  { %v3130_v18 = vpack.c.bf16 %v3129_v16, %v3128_v15 }
0x16cc   :  { %3274 = vmatmul.mubr.bf16.vlgmr.msra.gmra.mrb[48].mxu0 %v3130_v18 }
0x16cd   :  { %4553 = vmatpush3.bf16.msra.mxu0 %v4837_v17  ;;  %4568 = vmatprep.mubr.msk.bf16.mxu0 %vm5009_vm0, %v5008_v31 }
0x16ce   :  { %4554 = vmatprep.subr.bf16.mxu0 %v5008_v31 }
0x16d1   :  { %4555 = vmatpush3.bf16.msra.mxu0 %v4839_v63 }
0x16d2   :  { %4556 = vmatprep.subr.bf16.mxu0 %v5008_v31 }
0x16d5   :  { %4557 = vmatpush3.bf16.msra.mxu0 %v4841_v19 }
0x16d6   :  { %4558 = vmatprep.subr.bf16.mxu0 %v5008_v31 }
0x16d9   :  { %4559 = vmatpush3.bf16.msra.mxu0 %v4843_v20 }
0x16da   :  { %4560 = vmatprep.subr.bf16.mxu0 %v5008_v31 }
0x16dd   :  { %4561 = vmatpush3.bf16.msra.mxu0 %v4845_v21 }
0x16de   :  { %4562 = vmatprep.subr.bf16.mxu0 %v5008_v31 }
0x16e1   :  { %4563 = vmatpush3.bf16.msra.mxu0 %v4847_v22 }
0x16e2   :  { %4564 = vmatprep.subr.bf16.mxu0 %v5008_v31 }
0x16e5   :  { %4565 = vmatpush3.bf16.msra.mxu0 %v4849_v24 }
0x16e6   :  { %4566 = vmatprep.subr.bf16.mxu0 %v5008_v31 }
0x16e9   :  { %4567 = vmatpush3.bf16.msra.mxu0 %v4851_v26 }
0x179f   :  { %v3275_v30 = vpop.f32.mrb[48].mxu0 }
0x17a0   :  { %v3276_v32 = vadd.f32 %v3275_v30, %v3154_v28  ;;  %v3277_v33 = vpop.f32.mrb[49].mxu0 }
0x17a1   :  { %v3278_v34 = vadd.f32 %v3277_v33, %v3158_v29  ;;  %v3279_v35 = vpop.f32.mrb[50].mxu0 }
0x17a2   :  { %v3280_v36 = vadd.f32 %v3279_v35, %v3154_v28  ;;  %v3281_v31 = vpop.f32.mrb[51].mxu0  ;;  %v3284_v38 = vmax.f32 %v3276_v32, 0.0 }
0x17a3   :  { %v3282_v37 = vadd.f32 %v3281_v31, %v3158_v29  ;;  %v3285_v40 = vmax.f32 %v3278_v34, 0.0 }
0x17a4   :  { %v3286_v39 = vmax.f32 %v3280_v36, 0.0 }
0x17a5   :  { %v3287_v41 = vmax.f32 %v3282_v37, 0.0 }
0x17a6   :  { %v3288_v0 = vpack.c.bf16 %v3286_v39, %v3284_v38 }
0x17a7   :  { %v3405_v42 = vpack.c.bf16 %v3287_v41, %v3285_v40 }
0x17a8   :  { %4549 = vmatmul.mubr.bf16.vlgmr.msra.gmra.mrb[48].mxu1 %v3288_v0 }
0x17a9   :  { %4569 = vmatmul.mubr.bf16.vlgmr.msra.gmra.mrb[52].mxu0 %v3405_v42 }
0x187b   :  { %v3396_v45 = vpop.f32.mrb[48].mxu1 }
0x187c   :  { %v3397_v47 = vadd.f32 %v3841_v12, %v3396_v45  ;;  %v4550_v43 = vpop.f32.mrb[49].mxu1  ;;  %v3511_v44 = vpop.f32.mrb[52].mxu0 }
0x187d   :  { %v3512_v46 = vadd.f32 %v3841_v12, %v3511_v44  ;;  %v3399_v48 = vpop.f32.mrb[50].mxu1  ;;  %v4570_v50 = vpop.f32.mrb[53].mxu0 }
0x187e   :  { %3403 = vst [vmem:[%s5667_s10] sm:$0xff] %v3397_v47  ;;  %v3400_v51 = vadd.f32 %v3841_v12, %v3399_v48  ;;  %v4551_v52 = vpop.f32.mrb[51].mxu1  ;;  %v3514_v53 = vpop.f32.mrb[54].mxu0 }
0x187f   :  { %3518 = vst [vmem:[%s5667_s10 + $0x10] sm:$0xff] %v3512_v46  ;;  %v3515_v54 = vadd.f32 %v3841_v12, %v3514_v53  ;;  %v4571_v55 = vpop.f32.mrb[55].mxu0 }
0x1880   :  { %3404 = vst [vmem:[%s5667_s10 + $0x8] sm:$0xff] %v3400_v51 }
0x1881   :  { %3519 = vst [vmem:[%s5667_s10 + $0x18] sm:$0xff] %v3515_v54 }
0x1882   :  { %3528 = vsyncpa [#allocation3], 1 }
0x1883   :  { %3529 = vsyncpa [#allocation5], 1 }
0x1884   :  { %3530 = vsyncpa [#allocation8], 1 }
0x1885   :  { %3531 = vsyncpa [#allocation11], 1 }

</bundles_post_ra>
